<compile_context>
chip_gen: v7x
topology: tpu7x:2x2x1
jax: 0.10.0
libtpu: 0.0.40
codegen_flags: <defaults>
</compile_context>

<pallas_src>
import jax
import jax.numpy as jnp
from jax import lax
from jax.experimental import pallas as pl
from jax.experimental.pallas import tpu as pltpu


def _round_up(x, m):
    return (x + m - 1) // m * m


def _choose_rows_per_block(gh, gw, C, p, in_itemsize, e_pad,
                           max_rows=8, max_patches=512,
                           vmem_block_budget=4 * 1024 * 1024):
    """How many patch rows each grid step processes (must divide gh).

    The padded VMEM footprint of one input block is ~C*p*round_up(gw,8)*128*itemsize
    per patch row (lane dim p is padded to 128).  Keep the double-buffered
    input+output blocks within a small budget so the kernel fits the scoped-VMEM
    defaults of every TPU generation (16 MiB v5e / 32 MiB v6e / 32-of-64 MiB v7x).
    """
    row_in_bytes = C * p * _round_up(gw, 8) * 128 * in_itemsize
    row_out_bytes = _round_up(gw, 8) * e_pad * 4
    best = 1
    for r in range(1, min(gh, max_rows) + 1):
        if r * gw > max_patches:
            break
        if 2 * r * (row_in_bytes + row_out_bytes) > vmem_block_budget:
            break
        if gh % r == 0:
            best = r
    return best


def _patch_embed_kernel(x_ref, w_ref, b_ref, o_ref):
    # x_ref: (C, rpb, p, gw, p)  -- one block of patch rows, input dtype
    # w_ref: (C*p, p, E_pad)     -- conv weight, rearranged, compute dtype (bf16)
    # b_ref: (1, E_pad)          -- bias, float32
    # o_ref: (rpb, gw, E_pad)    -- output block
    C, rpb, p, gw, _ = x_ref.shape
    x = x_ref[...]
    w = w_ref[...]
    b = b_ref[...]
    for r in range(rpb):                            # small static unroll
        xr = x[:, r].reshape(C * p, gw, p)          # leading-dim merge only (free)
        xr = xr.astype(w.dtype)                     # bf16 operands for the MXU
        # Batched MXU matmul over k = (c, ph):
        #   acc[k, j, e] = sum_pw xr[k, j, pw] * w[k, pw, e]
        acc = lax.dot_general(
            xr, w,
            dimension_numbers=(((2,), (1,)), ((0,), (0,))),
            preferred_element_type=jnp.float32)     # (C*p, gw, E_pad), f32
        y = jnp.sum(acc, axis=0) + b                # (gw, E_pad), f32 bias add
        o_ref[r, :, :] = y.astype(o_ref.dtype)


def patch_embed_forward(x, weight, bias, patch_size, is_shape_info=False,
                        compute_dtype=jnp.bfloat16):
    """x: (B, C, H, W); weight: (E, C, p, p); bias: (E,).

    Returns (B, num_patches, E) [and optionally the Conv2d NCHW output shape],
    matching my_PatchEmbed.forward.
    """
    B, C, H, W = x.shape
    E = weight.shape[0]
    p = int(patch_size)
    assert weight.shape == (E, C, p, p)
    assert H % p == 0 and W % p == 0, "image size must be divisible by patch size"
    gh, gw = H // p, W // p
    N = gh * gw
    D = C * p * p
    e_pad = _round_up(E, 128)

    # Free view (pure split of contiguous dims, no data movement / HBM traffic).
    x6 = x.reshape(B, C, gh, p, gw, p)

    # Rearrange the conv weight once (tiny): (E, C, p, p) -> (C*p, p, E_pad) with
    # w3[c*p+ph, pw, e] = weight[e, c, ph, pw].  This folds the patch flatten
    # order into the weight so the kernel needs no transpose/relayout.
    w3 = jnp.transpose(weight, (1, 2, 3, 0)).reshape(C * p, p, E)
    b2 = bias.reshape(1, E).astype(jnp.float32)
    if e_pad != E:
        w3 = jnp.pad(w3, ((0, 0), (0, 0), (0, e_pad - E)))
        b2 = jnp.pad(b2, ((0, 0), (0, e_pad - E)))
    w3 = w3.astype(compute_dtype)

    rpb = _choose_rows_per_block(gh, gw, C, p, x.dtype.itemsize, e_pad)
    grid = (B, gh // rpb)

    bytes_accessed = (x.size * x.dtype.itemsize
                      + w3.size * w3.dtype.itemsize
                      + b2.size * 4
                      + B * N * e_pad * x.dtype.itemsize)

    out4 = pl.pallas_call(
        _patch_embed_kernel,
        out_shape=jax.ShapeDtypeStruct((B, gh, gw, e_pad), x.dtype),
        grid=grid,
        in_specs=[
            # One block of rpb patch rows, DMA'd straight from the NCHW buffer.
            pl.BlockSpec((pl.Squeezed(), C, rpb, p, gw, p),
                         lambda b, i: (b, 0, i, 0, 0, 0)),
            # Whole rearranged weight, resident across the grid.
            pl.BlockSpec((C * p, p, e_pad), lambda b, i: (0, 0, 0)),
            # Bias.
            pl.BlockSpec((1, e_pad), lambda b, i: (0, 0)),
        ],
        out_specs=pl.BlockSpec((pl.Squeezed(), rpb, gw, e_pad),
                               lambda b, i: (b, i, 0, 0)),
        compiler_params=pltpu.CompilerParams(
            dimension_semantics=("parallel", "parallel"),
            vmem_limit_bytes=32 * 1024 * 1024),
        cost_estimate=pl.CostEstimate(
            flops=2 * B * N * D * e_pad,
            transcendentals=0,
            bytes_accessed=int(bytes_accessed)),
    )(x6, w3, b2)

    # Free merge + (only when E was padded) a cheap slice.
    out = out4.reshape(B, N, e_pad)
    if e_pad != E:
        out = out[:, :, :E]

    patch_info_4d = (B, E, gh, gw)   # NCHW shape of the Conv2d output
    if is_shape_info:
        return out, patch_info_4d
    return out


if __name__ == "__main__":
    # Small shapes consistent with the module: img 16x16, patch 4, C=4, E=32.
    B, C, H, W = 2, 4, 16, 16
    patch_size = 4
    embed_dim = 32

    key = jax.random.PRNGKey(0)
    kx, kw, kb = jax.random.split(key, 3)
    x = jax.random.normal(kx, (B, C, H, W), dtype=jnp.float32)
    weight = jax.random.normal(
        kw, (embed_dim, C, patch_size, patch_size), dtype=jnp.float32) * 0.02
    bias = jax.random.normal(kb, (embed_dim,), dtype=jnp.float32) * 0.02

    gh, gw = H // patch_size, W // patch_size
    N, D = gh * gw, C * patch_size * patch_size

    # Reference: Conv2d with kernel_size == stride == patch_size as a matmul.
    ref_patches = x.reshape(B, C, gh, patch_size, gw, patch_size)
    ref_patches = ref_patches.transpose(0, 2, 4, 1, 3, 5).reshape(B, N, D)
    ref = ref_patches @ weight.reshape(embed_dim, D).T + bias

    # Default path: bf16 MXU operands, f32 accumulate.
    out_bf16, info = patch_embed_forward(x, weight, bias, patch_size,
                                         is_shape_info=True)
    out_bf16 = jax.block_until_ready(out_bf16)

    # Full-f32 path (tighter check of the indexing / weight-folding logic).
    out_f32 = patch_embed_forward(x, weight, bias, patch_size,
                                  compute_dtype=jnp.float32)
    out_f32 = jax.block_until_ready(out_f32)

    assert out_bf16.shape == (B, N, embed_dim)
    assert out_f32.shape == (B, N, embed_dim)
    assert info == (B, embed_dim, gh, gw)
    assert jnp.allclose(out_f32, ref, atol=5e-3, rtol=5e-3)
    assert jnp.allclose(out_bf16, ref, atol=2e-2, rtol=2e-2)

    print("KERNEL_OK")
</pallas_src>

<mosaic_0001>
module attributes {stable_mosaic.version = 11 : i64} {
  func.func @_patch_embed_kernel(%arg0: i32, %arg1: i32, %arg2: memref<1x4x4x4x4x4xf32, #tpu.memory_space<vmem>>, %arg3: memref<16x4x128xbf16, #tpu.memory_space<vmem>>, %arg4: memref<1x128xf32, #tpu.memory_space<vmem>>, %arg5: memref<1x4x4x128xf32, #tpu.memory_space<vmem>>) attributes {dimension_semantics = [#tpu.dimension_semantics<parallel>, #tpu.dimension_semantics<parallel>], iteration_bounds = array<i64: 2, 1>, scalar_prefetch = 0 : i64, scratch_operands = 0 : i64, tpu.core_type = #tpu.core_type<tc>, window_params = [{transform_indices = @transform_0, window_bounds = array<i64: 1, 4, 4, 4, 4, 4>}, {pipeline_mode = #tpu.pipeline_mode<synchronous>, transform_indices = @transform_1, window_bounds = array<i64: 16, 4, 128>}, {pipeline_mode = #tpu.pipeline_mode<synchronous>, transform_indices = @transform_2, window_bounds = array<i64: 1, 128>}, {transform_indices = @transform_3, window_bounds = array<i64: 1, 4, 4, 128>}]} {
    %c0 = arith.constant 0 : index
    %c0_0 = arith.constant 0 : index
    %c0_1 = arith.constant 0 : index
    %c0_2 = arith.constant 0 : index
    %c0_3 = arith.constant 0 : index
    %c0_4 = arith.constant 0 : index
    %0 = vector.load %arg2[%c0, %c0_0, %c0_1, %c0_2, %c0_3, %c0_4] : memref<1x4x4x4x4x4xf32, #tpu.memory_space<vmem>>, vector<1x4x4x4x4x4xf32>
    %1 = vector.shape_cast %0 : vector<1x4x4x4x4x4xf32> to vector<4x4x4x4x4xf32>
    %c0_5 = arith.constant 0 : index
    %c0_6 = arith.constant 0 : index
    %c0_7 = arith.constant 0 : index
    %2 = vector.load %arg3[%c0_5, %c0_6, %c0_7] : memref<16x4x128xbf16, #tpu.memory_space<vmem>>, vector<16x4x128xbf16>
    %c0_8 = arith.constant 0 : index
    %c0_9 = arith.constant 0 : index
    %3 = vector.load %arg4[%c0_8, %c0_9] : memref<1x128xf32, #tpu.memory_space<vmem>>, vector<1x128xf32>
    %4 = vector.extract_strided_slice %1 {offsets = [0, 0, 0, 0, 0], sizes = [4, 1, 4, 4, 4], strides = [1, 1, 1, 1, 1]} : vector<4x4x4x4x4xf32> to vector<4x1x4x4x4xf32>
    %5 = vector.shape_cast %4 : vector<4x1x4x4x4xf32> to vector<4x4x4x4xf32>
    %6 = vector.shape_cast %5 : vector<4x4x4x4xf32> to vector<16x4x4xf32>
    %7 = arith.truncf %6 : vector<16x4x4xf32> to vector<16x4x4xbf16>
    %cst = arith.constant dense<0.000000e+00> : vector<16x4x128xf32>
    %8 = tpu.matmul %7, %2, %cst {dimension_numbers = #tpu.dot_dimension_numbers<[2], [1], [1], [2], [0, 0, 0, 1, 1, 2], [0], [0]>} : vector<16x4x4xbf16>, vector<16x4x128xbf16>, vector<16x4x128xf32> -> vector<16x4x128xf32>
    %cst_10 = arith.constant dense<0.000000e+00> : vector<4x128xf32>
    %9 = vector.multi_reduction <add>, %8, %cst_10 [0] : vector<16x4x128xf32> to vector<4x128xf32>
    %10 = vector.broadcast %3 : vector<1x128xf32> to vector<4x128xf32>
    %11 = arith.addf %9, %10 : vector<4x128xf32>
    %c0_11 = arith.constant 0 : index
    %c0_12 = arith.constant 0 : index
    %c0_13 = arith.constant 0 : index
    %c0_14 = arith.constant 0 : index
    %12 = vector.load %arg5[%c0_11, %c0_12, %c0_13, %c0_14] : memref<1x4x4x128xf32, #tpu.memory_space<vmem>>, vector<1x1x4x128xf32>
    %13 = vector.shape_cast %12 : vector<1x1x4x128xf32> to vector<4x128xf32>
    %14 = vector.shape_cast %11 : vector<4x128xf32> to vector<1x1x4x128xf32>
    tpu.vector_store %arg5[%c0_11, %c0_12, %c0_13, %c0_14], %14 {strides = array<i32>} : memref<1x4x4x128xf32, #tpu.memory_space<vmem>>, vector<1x1x4x128xf32>,
    %15 = vector.extract_strided_slice %1 {offsets = [0, 1, 0, 0, 0], sizes = [4, 1, 4, 4, 4], strides = [1, 1, 1, 1, 1]} : vector<4x4x4x4x4xf32> to vector<4x1x4x4x4xf32>
    %16 = vector.shape_cast %15 : vector<4x1x4x4x4xf32> to vector<4x4x4x4xf32>
    %17 = vector.shape_cast %16 : vector<4x4x4x4xf32> to vector<16x4x4xf32>
    %18 = arith.truncf %17 : vector<16x4x4xf32> to vector<16x4x4xbf16>
    %cst_15 = arith.constant dense<0.000000e+00> : vector<16x4x128xf32>
    %19 = tpu.matmul %18, %2, %cst_15 {dimension_numbers = #tpu.dot_dimension_numbers<[2], [1], [1], [2], [0, 0, 0, 1, 1, 2], [0], [0]>} : vector<16x4x4xbf16>, vector<16x4x128xbf16>, vector<16x4x128xf32> -> vector<16x4x128xf32>
    %cst_16 = arith.constant dense<0.000000e+00> : vector<4x128xf32>
    %20 = vector.multi_reduction <add>, %19, %cst_16 [0] : vector<16x4x128xf32> to vector<4x128xf32>
    %21 = vector.broadcast %3 : vector<1x128xf32> to vector<4x128xf32>
    %22 = arith.addf %20, %21 : vector<4x128xf32>
    %c0_17 = arith.constant 0 : index
    %c1 = arith.constant 1 : index
    %c0_18 = arith.constant 0 : index
    %c0_19 = arith.constant 0 : index
    %23 = vector.load %arg5[%c0_17, %c1, %c0_18, %c0_19] : memref<1x4x4x128xf32, #tpu.memory_space<vmem>>, vector<1x1x4x128xf32>
    %24 = vector.shape_cast %23 : vector<1x1x4x128xf32> to vector<4x128xf32>
    %25 = vector.shape_cast %22 : vector<4x128xf32> to vector<1x1x4x128xf32>
    tpu.vector_store %arg5[%c0_17, %c1, %c0_18, %c0_19], %25 {strides = array<i32>} : memref<1x4x4x128xf32, #tpu.memory_space<vmem>>, vector<1x1x4x128xf32>,
    %26 = vector.extract_strided_slice %1 {offsets = [0, 2, 0, 0, 0], sizes = [4, 1, 4, 4, 4], strides = [1, 1, 1, 1, 1]} : vector<4x4x4x4x4xf32> to vector<4x1x4x4x4xf32>
    %27 = vector.shape_cast %26 : vector<4x1x4x4x4xf32> to vector<4x4x4x4xf32>
    %28 = vector.shape_cast %27 : vector<4x4x4x4xf32> to vector<16x4x4xf32>
    %29 = arith.truncf %28 : vector<16x4x4xf32> to vector<16x4x4xbf16>
    %cst_20 = arith.constant dense<0.000000e+00> : vector<16x4x128xf32>
    %30 = tpu.matmul %29, %2, %cst_20 {dimension_numbers = #tpu.dot_dimension_numbers<[2], [1], [1], [2], [0, 0, 0, 1, 1, 2], [0], [0]>} : vector<16x4x4xbf16>, vector<16x4x128xbf16>, vector<16x4x128xf32> -> vector<16x4x128xf32>
    %cst_21 = arith.constant dense<0.000000e+00> : vector<4x128xf32>
    %31 = vector.multi_reduction <add>, %30, %cst_21 [0] : vector<16x4x128xf32> to vector<4x128xf32>
    %32 = vector.broadcast %3 : vector<1x128xf32> to vector<4x128xf32>
    %33 = arith.addf %31, %32 : vector<4x128xf32>
    %c0_22 = arith.constant 0 : index
    %c2 = arith.constant 2 : index
    %c0_23 = arith.constant 0 : index
    %c0_24 = arith.constant 0 : index
    %34 = vector.load %arg5[%c0_22, %c2, %c0_23, %c0_24] : memref<1x4x4x128xf32, #tpu.memory_space<vmem>>, vector<1x1x4x128xf32>
    %35 = vector.shape_cast %34 : vector<1x1x4x128xf32> to vector<4x128xf32>
    %36 = vector.shape_cast %33 : vector<4x128xf32> to vector<1x1x4x128xf32>
    tpu.vector_store %arg5[%c0_22, %c2, %c0_23, %c0_24], %36 {strides = array<i32>} : memref<1x4x4x128xf32, #tpu.memory_space<vmem>>, vector<1x1x4x128xf32>,
    %37 = vector.extract_strided_slice %1 {offsets = [0, 3, 0, 0, 0], sizes = [4, 1, 4, 4, 4], strides = [1, 1, 1, 1, 1]} : vector<4x4x4x4x4xf32> to vector<4x1x4x4x4xf32>
    %38 = vector.shape_cast %37 : vector<4x1x4x4x4xf32> to vector<4x4x4x4xf32>
    %39 = vector.shape_cast %38 : vector<4x4x4x4xf32> to vector<16x4x4xf32>
    %40 = arith.truncf %39 : vector<16x4x4xf32> to vector<16x4x4xbf16>
    %cst_25 = arith.constant dense<0.000000e+00> : vector<16x4x128xf32>
    %41 = tpu.matmul %40, %2, %cst_25 {dimension_numbers = #tpu.dot_dimension_numbers<[2], [1], [1], [2], [0, 0, 0, 1, 1, 2], [0], [0]>} : vector<16x4x4xbf16>, vector<16x4x128xbf16>, vector<16x4x128xf32> -> vector<16x4x128xf32>
    %cst_26 = arith.constant dense<0.000000e+00> : vector<4x128xf32>
    %42 = vector.multi_reduction <add>, %41, %cst_26 [0] : vector<16x4x128xf32> to vector<4x128xf32>
    %43 = vector.broadcast %3 : vector<1x128xf32> to vector<4x128xf32>
    %44 = arith.addf %42, %43 : vector<4x128xf32>
    %c0_27 = arith.constant 0 : index
    %c3 = arith.constant 3 : index
    %c0_28 = arith.constant 0 : index
    %c0_29 = arith.constant 0 : index
    %45 = vector.load %arg5[%c0_27, %c3, %c0_28, %c0_29] : memref<1x4x4x128xf32, #tpu.memory_space<vmem>>, vector<1x1x4x128xf32>
    %46 = vector.shape_cast %45 : vector<1x1x4x128xf32> to vector<4x128xf32>
    %47 = vector.shape_cast %44 : vector<4x128xf32> to vector<1x1x4x128xf32>
    tpu.vector_store %arg5[%c0_27, %c3, %c0_28, %c0_29], %47 {strides = array<i32>} : memref<1x4x4x128xf32, #tpu.memory_space<vmem>>, vector<1x1x4x128xf32>,
    return
  }
  func.func @transform_0(%arg0: i32, %arg1: i32) -> (i32, i32, i32, i32, i32, i32) {
    %c0_i32 = arith.constant 0 : i32
    %c0_i32_0 = arith.constant 0 : i32
    %c0_i32_1 = arith.constant 0 : i32
    %c0_i32_2 = arith.constant 0 : i32
    %c0_i32_3 = arith.constant 0 : i32
    return %arg0, %c0_i32, %arg1, %c0_i32_0, %c0_i32_1, %c0_i32_2 : i32, i32, i32, i32, i32, i32
  }
  func.func @transform_1(%arg0: i32, %arg1: i32) -> (i32, i32, i32) {
    %c0_i32 = arith.constant 0 : i32
    %c0_i32_0 = arith.constant 0 : i32
    %c0_i32_1 = arith.constant 0 : i32
    %c0_i32_2 = arith.constant 0 : i32
    return %c0_i32, %c0_i32_0, %c0_i32_1 : i32, i32, i32
  }
  func.func @transform_2(%arg0: i32, %arg1: i32) -> (i32, i32) {
    %c0_i32 = arith.constant 0 : i32
    %c0_i32_0 = arith.constant 0 : i32
    %c0_i32_1 = arith.constant 0 : i32
    return %c0_i32, %c0_i32_0 : i32, i32
  }
  func.func @transform_3(%arg0: i32, %arg1: i32) -> (i32, i32, i32, i32) {
    %c0_i32 = arith.constant 0 : i32
    %c0_i32_0 = arith.constant 0 : i32
    %c0_i32_1 = arith.constant 0 : i32
    return %arg0, %arg1, %c0_i32, %c0_i32_0 : i32, i32, i32, i32
  }
}

</mosaic_0001>

<bundles_post_ra>
// kernel: tpu_custom_call.1
= control target key start
LH: loop header
LB: loop body
LE: loop exit
PB: predicated region body
PF: predicated region fallthrough
CT: control target
= control target key end

     0   :  { %8 = vsyncpa [#allocation3], 0  ;;  %s5019_s0 = inlined_call_operand.hbm [shape: f32[2,4,4,4,4,4], index: 0, kind: input, shape index: {}]   ;;  %s5020_s1 = inlined_call_operand.hbm [shape: bf16[16,4,128], index: 1, kind: input, shape index: {}]   ;;  %s5021_s2 = inlined_call_operand.vmem [shape: f32[1,128], index: 2, kind: input, shape index: {}]   ;;  %s5022_s3 = inlined_call_operand.hbm [shape: f32[2,4,4,128], index: 3, kind: output, shape index: {}]  }
   0x1   :  { %10 = vsyncpa [#allocation3 + $0x1], 0 }
   0x2   :  { %11 = vsyncpa [#allocation6], 0 }
   0x3   :  { %12 = vsyncpa [#allocation4], 0 }
   0x4   :  { %14 = vsyncpa [#allocation4 + $0x1], 0  ;;  %s4285_s12 = smov 0   ;;  %s4287_s13 = smov 0  }
   0x5   :  { %s4289_s14 = smov 0   ;;  %s4291_s15 = smov 0  }
   0x6   :  { %s4293_s16 = smov 0   ;;  %s4295_s17 = smov 0  }
   0x7 LB: > { %s3428_s18 = sadd.s32 4294967295, %s4252_s17   ;;  %s3429_s19 = sadd.s32 4294967294, %s4252_s17   ;;  %s4252_s17 = sphi %s4295_s17, %s20_s17   ;;  %s4248_s16 = sphi %s4293_s16, %s5046_s16   ;;  %s4244_s15 = sphi %s4291_s15, %s5045_s15   ;;  %s4240_s14 = sphi %s4289_s14, %s5044_s14   ;;  %s4236_s13 = sphi %s4287_s13, %s5043_s13   ;;  %s4232_s12 = sphi %s4285_s12, %s5042_s12  }
   0x8   : > { %p54_p0 = scmp.ne.s32.totalorder %s4236_s13, %s4232_s12  ;;  %p4319_p1 = scmp.eq.s32.totalorder %s3428_s18, 0 }
   0x9   : > { %p4323_p2 = scmp.eq.s32.totalorder %s3428_s18, 1  ;;  %p128_p3 = scmp.eq.s32.totalorder %s3429_s19, 1 }
   0xa   : > { %s5027_s20 = scalar_select %p4319_p1, 1, 0 }
   0xb   : > { %s5028_s21 = scalar_select %p4323_p2, 1, 0 }
   0xc   : > { %p4329_p4 = por %p4319_p1, %p54_p0  ;;  %p3430_p5 = scmp.ge.s32.totalorder %s4252_s17, 1 }
   0xd   : > { %p4334_p6 = por %p128_p3, %p54_p0  ;;  %p135_p7 = scmp.lt.s32.totalorder %s4252_s17, 3 }
   0xe   : > { %s5029_s22 = scalar_select %p4329_p4, 1, 0 }
   0xf   : > { %s5030_s23 = scalar_select %p4334_p6, 1, 0 }
  0x10   : > { %p4339_p8 = pnand %p3430_p5, %p135_p7  ;;  %s4254_s25 = smov [#allocation5]  }
  0x11   : > { %s147_s26 = sshll.u32 %s4254_s25, 4  ;;  %s32_s28 = sadd.s32 1, %s4248_s16  ;;  %s148_s26 = int_to_ptr.vmem [resolvable:$true] %s147_s26 }
  0x12   : > { %s5031_s24 = scalar_select %p4339_p8, 1, 0 }
  0x13   : > { %p4035_p9 = pneg %p4339_p8  ;;  %s4108_s4 = scalar_lea.hbm %s5020_s1, 512 }
  0x14   : > { %p4109_p12 = scmp.ne.s32.totalorder %s5020_s1, %s4108_s4  ;;  %p4115_p5 = scmp.lt.u32.totalorder %s4108_s4, %s5020_s1 }
  0x15   : > { %p4348_p11 = pnand %p4035_p9, %p4319_p1 }
  0x17   : > { %p4110_p13 = pneg %p4348_p11 }
  0x19   : > { %p4111_p0 = pnand %p4110_p13, %p4109_p12 }
  0x1b   : > { %p4112_p3 = pneg %p4111_p0 }
  0x1d   : > { %p4117_p7 = pnand %p4115_p5, %p4112_p3 }
  0x1f   : > { %4120 = shalt.err (!%p4117_p7)
}
  0x20   : > { %s4121_s9 = scalar_lea.vmem %s148_s26, 512  ;;  %p4129_p1 = scmp.lt.s32.totalorder %s148_s26, %s148_s26 }
  0x21   : > { %p4122_p9 = scmp.ne.s32.totalorder %s148_s26, %s4121_s9  ;;  %p4130_p4 = scmp.lt.s32.totalorder %s4121_s9, %s4121_s9 }
  0x23   : > { %p4124_p10 = pnand %p4122_p9, %p4110_p13  ;;  %p4131_p8 = por %p4130_p4, %p4129_p1 }
  0x25   : > { %p4125_p6 = pneg %p4124_p10 }
  0x27   : > { %p4132_p2 = pnand %p4131_p8, %p4125_p6 }
  0x29   : > { %4135 = shalt.err (!%p4132_p2)
}
  0x2a   : > { %s4255_s10 = smov 32   ;;  %s4256_s11 = smov 2  }
  0x2b   : > { %4038 = dma.hbm_to_vmem [thread:$0]  (!%p4348_p11), %s5020_s1, 512, %s148_s26, [#allocation6], %s4255_s10, %s4255_s10, %s4256_s11  }
  0x2c   : > { %p34_p1 = scmp.ge.s32.totalorder %s32_s28, 2  ;;  %s41_s25 = sadd.s32 1, %s4240_s14 }
  0x2d   : > { %p48_p2 = scmp.ne.s32.totalorder %s4240_s14, %s4236_s13  ;;  %p49_p4 = scmp.eq.s32.totalorder %s4252_s17, 0 }
  0x2e   : > { %s5048_s28 = smov (%p34_p1, %s32_s28), 0  ;;  %p5034_p8 = scmp.ne.s32.totalorder %s5028_s21, 0 }
  0x2f   : > { %p4375_p6 = por %p49_p4, %p48_p2  ;;  %s36_s27 = ssub.s32 %s4248_s16, %s5048_s28 }
  0x30   : > { %p4381_p10 = por %p5034_p8, %p48_p2  ;;  %p4048_p12 = scmp.lt.s32.totalorder %s4252_s17, 2 }
  0x31   : > { %p39_p11 = scmp.eq.s32.totalorder %s36_s27, 0  ;;  %s164_s26 = sand.u32 1, %s4240_s14  }
  0x32   : > { %s3433_s4 = sshll.u32 %s164_s26, 8  ;;  %s3513_s6 = sshll.u32 %s4248_s16, 12 }
  0x33   : > { %s4390_s5 = scalar_select %p39_p11, %s4240_s14, %s41_s25  }
  0x34   : > { %s4396_s9 = scalar_lea.hbm %s5019_s0, %s3513_s6  ;;  %s168_s21 = scalar_lea.vmem [#allocation2], %s3433_s4 }
  0x35   : > { %s178_s10 = sshll.u32 %s168_s21, 4  ;;  %p4402_p13 = pnand %p4048_p12, %p4375_p6  ;;  %s4398_s10 = int_to_ptr.vmem [resolvable:$true] %s178_s10 }
  0x36   : > { %s4406_s18 = scalar_lea.sflag [#allocation3], %s164_s26  ;;  %s4136_s19 = scalar_lea.hbm %s4396_s9, 4096 }
  0x37   : > { %p4137_p0 = scmp.ne.s32.totalorder %s4396_s9, %s4136_s19  ;;  %p4138_p3 = pneg %p4402_p13 }
  0x38   : > { %s4141_s29 = scalar_lea.hbm %s5019_s0, 8192  ;;  %p4142_p9 = scmp.lt.u32.totalorder %s4396_s9, %s5019_s0 }
  0x39   : > { %p4139_p5 = pnand %p4138_p3, %p4137_p0  ;;  %p4143_p1 = scmp.lt.u32.totalorder %s4141_s29, %s4136_s19 }
  0x3a   : > { %p4145_p4 = scmp.lt.u32.totalorder %s4136_s19, %s4396_s9 }
  0x3b   : > { %p4140_p7 = pneg %p4139_p5  ;;  %p4144_p2 = por %p4143_p1, %p4142_p9 }
  0x3d   : > { %p4146_p6 = por %p4145_p4, %p4144_p2 }
  0x3f   : > { %p4147_p8 = pnand %p4146_p6, %p4140_p7 }
  0x41   : > { %4150 = shalt.err (!%p4147_p8)
}
  0x42   : > { %s4151_s26 = scalar_lea.vmem %s4398_s10, 4096  ;;  %s4257_s7 = smov [#allocation2]  }
  0x43   : > { %p4152_p12 = scmp.ne.s32.totalorder %s4398_s10, %s4151_s26  ;;  %s4156_s8 = sshll.u32 %s4257_s7, 4  ;;  %s4157_s8 = int_to_ptr.vmem [resolvable:$false] %s4156_s8 }
  0x44   : > { %s4158_s21 = scalar_lea.vmem %s4157_s8, 8192  ;;  %p4159_p5 = scmp.lt.s32.totalorder %s4398_s10, %s4157_s8 }
  0x45   : > { %p4154_p11 = pnand %p4152_p12, %p4138_p3  ;;  %p4160_p9 = scmp.lt.s32.totalorder %s4158_s21, %s4151_s26 }
  0x47   : > { %p4155_p0 = pneg %p4154_p11  ;;  %p4161_p1 = por %p4160_p9, %p4159_p5 }
  0x49   : > { %p4162_p2 = pnand %p4161_p1, %p4155_p0 }
  0x4b   : > { %4165 = shalt.err (!%p4162_p2)
}
  0x4c   : > { %s4258_s19 = smov 64   ;;  %s4259_s25 = smov 4  }
  0x4d   : > { %4042 = dma.hbm_to_vmem [thread:$0]  (!%p4402_p13), %s4396_s9, 4096, %s4398_s10, %s4406_s18, %s4258_s19, %s4258_s19, %s4259_s25  }
  0x4e   : > { %p5037_p3 = scmp.ne.s32.totalorder %s5031_s24, 0 }
  0x4f   : > { %s4437_s27 = sand.u32 (!%p5037_p3), 1, %s4236_s13   ;;  %p5038_p7 = scmp.ne.s32.totalorder (!%p5037_p3), %s5029_s22, 0 }
  0x50   : > { %190 = sbr.rel (%p5037_p3) target bundleno = 579 (0x243), region = 32  ;;  %s3437_s29 = sshll.u32 (!%p5037_p3), %s4437_s27, 8 }
  0x51   : > { %s193_s4 = scalar_lea.sflag (!%p5037_p3), [#allocation3], %s4437_s27  ;;  %s4441_s6 = scalar_lea.vmem (!%p5037_p3), [#allocation2], %s3437_s29 }
  0x57   : > { %4219 = dma.done.wait (%p5038_p7), %s193_s4, 4096  }
  0x58   : > { %4221 = vsyncadd (%p5038_p7), %s193_s4, 4294963200  ;;  %p5039_p13 = scmp.ne.s32.totalorder %s5027_s20, 0 }
  0x5a   : > { %4223 = dma.done.wait (%p5039_p13), [#allocation6], 512  }
  0x5b   : > { %4225 = vsyncadd (%p5039_p13), [#allocation6], 4294966784  ;;  %v4260_v0 = vmov 0.0   ;;  %vm4261_vm0 = vmmov 0   ;;  %vm327_vm1 = vcmask 1041408   ;;  %vm323_vm2 = vcmask 31744  }
  0x5c   : > { %3643 = vmatprep.subr.bf16.mxu0 %v4260_v0  ;;  %3649 = vmatprep.subr.bf16.mxu1 %v4260_v0  ;;  %v290_v1 = vld [vmem:[#allocation5] sm:$0x3]  ;;  %v291_v2 = vld [vmem:[#allocation5 + $0x2] sm:$0x3]  ;;  %v227_v7 = vld [vmem:[%s4441_s6 + $0x4] sm:$0xf] }
  0x5d   : > { %3645 = vmatprep.mubr.msk.bf16.mxu0 %vm4261_vm0, %v4260_v0  ;;  %3651 = vmatprep.mubr.msk.bf16.mxu1 %vm4261_vm0, %v4260_v0  ;;  %v226_v3 = vld [vmem:[%s4441_s6] sm:$0xf]  ;;  %v4459_v4 = vsel %vm327_vm1, %v290_v1, 0  ;;  %v4462_v5 = vsel %vm327_vm1, %v291_v2, 0  ;;  %v292_v8 = vld [vmem:[#allocation5 + $0x4] sm:$0x3]  ;;  %v308_v9 = vpack.c.bf16 %v227_v7, %v227_v7 }
  0x5e   : > { %v307_v6 = vpack.c.bf16 %v226_v3, %v226_v3  ;;  %3644 = vmatpush3.bf16.msra.mxu0 %v4459_v4  ;;  %3650 = vmatpush3.bf16.msra.mxu1 %v4462_v5  ;;  %v293_v10 = vld [vmem:[#allocation5 + $0x6] sm:$0x3]  ;;  %v4469_v11 = vsel %vm327_vm1, %v292_v8, 0  ;;  %v228_v13 = vld [vmem:[%s4441_s6 + $0x8] sm:$0xf]  ;;  %vm1061_vm3 = vcmask 1043456  }
  0x5f   : > { %3655 = vmatprep.subr.bf16.mxu0 %v4260_v0  ;;  %3661 = vmatprep.subr.bf16.mxu1 %v4260_v0  ;;  %v4473_v12 = vsel %vm327_vm1, %v293_v10, 0  ;;  %v229_v14 = vld [vmem:[%s4441_s6 + $0xc] sm:$0xf]  ;;  %v294_v15 = vld [vmem:[#allocation5 + $0x8] sm:$0x3]  ;;  %v309_v17 = vpack.c.bf16 %v228_v13, %v228_v13  ;;  %s3439_s20 = sshll.u32 %s4437_s27, 4 }
  0x60   : > { %v295_v16 = vld [vmem:[#allocation5 + $0xa] sm:$0x3]  ;;  %v310_v18 = vpack.c.bf16 %v229_v14, %v229_v14  ;;  %v4488_v19 = vsel %vm327_vm1, %v294_v15, 0  ;;  %v242_v21 = vld [vmem:[%s4441_s6 + $0x40] sm:$0xf]  ;;  %s4906_s9 = scalar_lea.vmem [#allocation7], %s3439_s20 }
  0x61   : > { %3646 = vmatmul.mubr.msk.bf16.vlgmr.msra.gmra.mrb[0].mxu0 %vm323_vm2, %v307_v6  ;;  %3652 = vmatmul.mubr.msk.bf16.vlgmr.msra.gmra.mrb[0].mxu1 %vm323_vm2, %v308_v9  ;;  %v4491_v20 = vsel %vm327_vm1, %v295_v16, 0  ;;  %v243_v22 = vld [vmem:[%s4441_s6 + $0x44] sm:$0xf]  ;;  %v296_v23 = vld [vmem:[#allocation5 + $0xc] sm:$0x3]  ;;  %v311_v25 = vpack.c.bf16 %v242_v21, %v242_v21  ;;  %s3331_s10 = sshll.u32 %s4906_s9, 4  ;;  %s4963_s10 = int_to_ptr.vmem [resolvable:$true] %s3331_s10 }
  0x62   : > { %3656 = vmatpush3.bf16.msra.mxu0 %v4469_v11  ;;  %3662 = vmatpush3.bf16.msra.mxu1 %v4473_v12  ;;  %v297_v24 = vld [vmem:[#allocation5 + $0xe] sm:$0x3]  ;;  %v312_v26 = vpack.c.bf16 %v243_v22, %v243_v22  ;;  %v4506_v27 = vsel %vm327_vm1, %v296_v23, 0  ;;  %v244_v29 = vld [vmem:[%s4441_s6 + $0x48] sm:$0xf]  ;;  %s3514_s11 = sshll.u32 %s4244_s15, 8 }
  0x63   : > { %3657 = vmatprep.mubr.msk.bf16.mxu0 %vm4261_vm0, %v4260_v0  ;;  %3663 = vmatprep.mubr.msk.bf16.mxu1 %vm4261_vm0, %v4260_v0  ;;  %v4509_v28 = vsel %vm327_vm1, %v297_v24, 0  ;;  %v245_v30 = vld [vmem:[%s4441_s6 + $0x4c] sm:$0xf]  ;;  %v298_v31 = vld [vmem:[#allocation5 + $0x10] sm:$0x3]  ;;  %v313_v33 = vpack.c.bf16 %v244_v29, %v244_v29  ;;  %s4968_s7 = scalar_lea.hbm %s5022_s3, %s3514_s11  ;;  %s3316_s8 = scalar_lea.sflag [#allocation4], %s4437_s27 }
  0x64   : > { %3667 = vmatprep.subr.bf16.mxu0 %v4260_v0  ;;  %3673 = vmatprep.subr.bf16.mxu1 %v4260_v0  ;;  %v299_v32 = vld [vmem:[#allocation5 + $0x12] sm:$0x3]  ;;  %v314_v34 = vpack.c.bf16 %v245_v30, %v245_v30  ;;  %v4524_v35 = vsel %vm327_vm1, %v298_v31, 0  ;;  %v258_v37 = vld [vmem:[%s4441_s6 + $0x80] sm:$0xf]  ;;  %s4166_s21 = scalar_lea.vmem %s4963_s10, 256 }
  0x65   : > { %v4527_v36 = vsel %vm327_vm1, %v299_v32, 0  ;;  %v259_v38 = vld [vmem:[%s4441_s6 + $0x84] sm:$0xf]  ;;  %v300_v39 = vld [vmem:[#allocation5 + $0x14] sm:$0x3]  ;;  %v315_v41 = vpack.c.bf16 %v258_v37, %v258_v37  ;;  %p4167_p4 = scmp.ne.s32.totalorder %s4963_s10, %s4166_s21  ;;  %s4262_s15 = smov [#allocation7]  }
  0x66   : > { %v301_v40 = vld [vmem:[#allocation5 + $0x16] sm:$0x3]  ;;  %v316_v42 = vpack.c.bf16 %v259_v38, %v259_v38  ;;  %v4542_v43 = vsel %vm327_vm1, %v300_v39, 0  ;;  %v260_v45 = vld [vmem:[%s4441_s6 + $0x88] sm:$0xf]  ;;  %s4170_s19 = sshll.u32 %s4262_s15, 4  ;;  %s4171_s19 = int_to_ptr.vmem [resolvable:$false] %s4170_s19 }
  0x67   : > { %v4545_v44 = vsel %vm327_vm1, %v301_v40, 0  ;;  %v261_v46 = vld [vmem:[%s4441_s6 + $0x8c] sm:$0xf]  ;;  %v302_v47 = vld [vmem:[#allocation5 + $0x18] sm:$0x3]  ;;  %v317_v49 = vpack.c.bf16 %v260_v45, %v260_v45  ;;  %p4168_p6 = pnand %p4167_p4, %p4381_p10  ;;  %s4172_s25 = scalar_lea.vmem %s4171_s19, 512 }
  0x68   : > { %v303_v48 = vld [vmem:[#allocation5 + $0x1a] sm:$0x3]  ;;  %v318_v50 = vpack.c.bf16 %v261_v46, %v261_v46  ;;  %v4560_v51 = vsel %vm327_vm1, %v302_v47, 0  ;;  %v274_v53 = vld [vmem:[%s4441_s6 + $0xc0] sm:$0xf]  ;;  %p4173_p12 = scmp.lt.s32.totalorder %s4963_s10, %s4171_s19  ;;  %p4174_p11 = scmp.lt.s32.totalorder %s4172_s25, %s4166_s21 }
  0x69   : > { %3658 = vmatmul.mubr.msk.bf16.vlgmr.msra.gmra.mrb[4].mxu0 %vm323_vm2, %v309_v17  ;;  %3664 = vmatmul.mubr.msk.bf16.vlgmr.msra.gmra.mrb[4].mxu1 %vm323_vm2, %v310_v18  ;;  %v4563_v52 = vsel %vm327_vm1, %v303_v48, 0  ;;  %v275_v54 = vld [vmem:[%s4441_s6 + $0xc4] sm:$0xf]  ;;  %v304_v55 = vld [vmem:[#allocation5 + $0x1c] sm:$0x3]  ;;  %v319_v57 = vpack.c.bf16 %v274_v53, %v274_v53  ;;  %p4169_p8 = pneg %p4168_p6 }
  0x6a   : > { %3668 = vmatpush3.bf16.msra.mxu0 %v4488_v19  ;;  %3674 = vmatpush3.bf16.msra.mxu1 %v4491_v20  ;;  %v305_v56 = vld [vmem:[#allocation5 + $0x1e] sm:$0x3]  ;;  %v320_v58 = vpack.c.bf16 %v275_v54, %v275_v54  ;;  %v4578_v59 = vsel %vm327_vm1, %v304_v55, 0  ;;  %v276_v61 = vld [vmem:[%s4441_s6 + $0xc8] sm:$0xf]  ;;  %p4175_p0 = por %p4174_p11, %p4173_p12 }
  0x6b   : > { %3669 = vmatprep.mubr.msk.bf16.mxu0 %vm4261_vm0, %v4260_v0  ;;  %3675 = vmatprep.mubr.msk.bf16.mxu1 %vm4261_vm0, %v4260_v0  ;;  %v4581_v60 = vsel %vm327_vm1, %v305_v56, 0  ;;  %v277_v62 = vld [vmem:[%s4441_s6 + $0xcc] sm:$0xf]  ;;  %v321_v63 = vpack.c.bf16 %v276_v61, %v276_v61  ;;  %v230_v2 = vld [vmem:[%s4441_s6 + $0x10] sm:$0xf] }
  0x6c   : > { %3679 = vmatprep.subr.bf16.mxu0 %v4260_v0  ;;  %3685 = vmatprep.subr.bf16.mxu1 %v4260_v0  ;;  %v322_v1 = vpack.c.bf16 %v277_v62, %v277_v62  ;;  %v231_v3 = vld [vmem:[%s4441_s6 + $0x14] sm:$0xf]  ;;  %v1101_v6 = vpack.c.bf16 %v230_v2, %v230_v2  ;;  %v232_v8 = vld [vmem:[%s4441_s6 + $0x18] sm:$0xf]  ;;  %v233_v9 = vld [vmem:[%s4441_s6 + $0x1c] sm:$0xf]  ;;  %p4176_p5 = pnand %p4175_p0, %p4169_p8 }
  0x6d   : > { %v1102_v7 = vpack.c.bf16 %v231_v3, %v231_v3  ;;  %v1103_v10 = vpack.c.bf16 %v232_v8, %v232_v8  ;;  %v1104_v13 = vpack.c.bf16 %v233_v9, %v233_v9  ;;  %v246_v14 = vld [vmem:[%s4441_s6 + $0x50] sm:$0xf]  ;;  %v247_v15 = vld [vmem:[%s4441_s6 + $0x54] sm:$0xf]  ;;  %v248_v18 = vld [vmem:[%s4441_s6 + $0x58] sm:$0xf] }
  0x6e   : > { %v1105_v16 = vpack.c.bf16 %v246_v14, %v246_v14  ;;  %v1106_v17 = vpack.c.bf16 %v247_v15, %v247_v15  ;;  %v249_v21 = vld [vmem:[%s4441_s6 + $0x5c] sm:$0xf]  ;;  %v1107_v22 = vpack.c.bf16 %v248_v18, %v248_v18  ;;  %v262_v24 = vld [vmem:[%s4441_s6 + $0x90] sm:$0xf]  ;;  %v264_v30 = vld [vmem:[%s4441_s6 + $0x98] sm:$0xf] }
  0x6f   : > { %v1108_v23 = vpack.c.bf16 %v249_v21, %v249_v21  ;;  %v265_v31 = vld [vmem:[%s4441_s6 + $0x9c] sm:$0xf]  ;;  %v1111_v32 = vpack.c.bf16 %v264_v30, %v264_v30  ;;  %v279_v37 = vld [vmem:[%s4441_s6 + $0xd4] sm:$0xf]  ;;  %v280_v40 = vld [vmem:[%s4441_s6 + $0xd8] sm:$0xf] }
  0x70   : > { %v1114_v39 = vpack.c.bf16 %v279_v37, %v279_v37  ;;  %v234_v46 = vld [vmem:[%s4441_s6 + $0x20] sm:$0xf]  ;;  %v235_v47 = vld [vmem:[%s4441_s6 + $0x24] sm:$0xf]  ;;  %v237_v53 = vld [vmem:[%s4441_s6 + $0x2c] sm:$0xf] }
  0x71   : > { %3670 = vmatmul.mubr.msk.bf16.vlgmr.msra.gmra.mrb[8].mxu0 %vm323_vm2, %v311_v25  ;;  %3676 = vmatmul.mubr.msk.bf16.vlgmr.msra.gmra.mrb[8].mxu1 %vm323_vm2, %v312_v26  ;;  %v263_v25 = vld [vmem:[%s4441_s6 + $0x94] sm:$0xf]  ;;  %v1109_v26 = vpack.c.bf16 %v262_v24, %v262_v24  ;;  %v1839_v48 = vpack.c.bf16 %v234_v46, %v234_v46  ;;  %v1842_v55 = vpack.c.bf16 %v237_v53, %v237_v53  ;;  %v250_v56 = vld [vmem:[%s4441_s6 + $0x60] sm:$0xf]  ;;  %v252_v62 = vld [vmem:[%s4441_s6 + $0x68] sm:$0xf] }
  0x72   : > { %3680 = vmatpush3.bf16.msra.mxu0 %v4506_v27  ;;  %3686 = vmatpush3.bf16.msra.mxu1 %v4509_v28  ;;  %v1110_v29 = vpack.c.bf16 %v263_v25, %v263_v25  ;;  %v266_v3 = vld [vmem:[%s4441_s6 + $0xa0] sm:$0xf]  ;;  %v268_v9 = vld [vmem:[%s4441_s6 + $0xa8] sm:$0xf]  ;;  %v238_v25 = vld [vmem:[%s4441_s6 + $0x30] sm:$0xf] }
  0x73   : > { %3681 = vmatprep.mubr.msk.bf16.mxu0 %vm4261_vm0, %v4260_v0  ;;  %3687 = vmatprep.mubr.msk.bf16.mxu1 %vm4261_vm0, %v4260_v0  ;;  %v282_v15 = vld [vmem:[%s4441_s6 + $0xe0] sm:$0xf]  ;;  %v284_v21 = vld [vmem:[%s4441_s6 + $0xe8] sm:$0xf]  ;;  %v271_v53 = vld [vmem:[%s4441_s6 + $0xb4] sm:$0xf] }
  0x74   : > { %3691 = vmatprep.subr.bf16.mxu0 %v4260_v0  ;;  %3697 = vmatprep.subr.bf16.mxu1 %v4260_v0 }
  0x79   : > { %3682 = vmatmul.mubr.msk.bf16.vlgmr.msra.gmra.mrb[12].mxu0 %vm323_vm2, %v313_v33  ;;  %3688 = vmatmul.mubr.msk.bf16.vlgmr.msra.gmra.mrb[12].mxu1 %vm323_vm2, %v314_v34  ;;  %v1112_v33 = vpack.c.bf16 %v265_v31, %v265_v31  ;;  %v278_v34 = vld [vmem:[%s4441_s6 + $0xd0] sm:$0xf] }
  0x7a   : > { %3692 = vmatpush3.bf16.msra.mxu0 %v4524_v35  ;;  %3698 = vmatpush3.bf16.msra.mxu1 %v4527_v36  ;;  %v1113_v38 = vpack.c.bf16 %v278_v34, %v278_v34 }
  0x7b   : > { %3693 = vmatprep.mubr.msk.bf16.mxu0 %vm4261_vm0, %v4260_v0  ;;  %3699 = vmatprep.mubr.msk.bf16.mxu1 %vm4261_vm0, %v4260_v0 }
  0x7c   : > { %3703 = vmatprep.subr.bf16.mxu0 %v4260_v0  ;;  %3709 = vmatprep.subr.bf16.mxu1 %v4260_v0 }
  0x81   : > { %3694 = vmatmul.mubr.msk.bf16.vlgmr.msra.gmra.mrb[16].mxu0 %vm323_vm2, %v315_v41  ;;  %3700 = vmatmul.mubr.msk.bf16.vlgmr.msra.gmra.mrb[16].mxu1 %vm323_vm2, %v316_v42  ;;  %v281_v41 = vld [vmem:[%s4441_s6 + $0xdc] sm:$0xf]  ;;  %v1115_v42 = vpack.c.bf16 %v280_v40, %v280_v40 }
  0x82   : > { %3704 = vmatpush3.bf16.msra.mxu0 %v4542_v43  ;;  %3710 = vmatpush3.bf16.msra.mxu1 %v4545_v44  ;;  %v1116_v45 = vpack.c.bf16 %v281_v41, %v281_v41 }
  0x83   : > { %3705 = vmatprep.mubr.msk.bf16.mxu0 %vm4261_vm0, %v4260_v0  ;;  %3711 = vmatprep.mubr.msk.bf16.mxu1 %vm4261_vm0, %v4260_v0 }
  0x84   : > { %3715 = vmatprep.subr.bf16.mxu0 %v4260_v0  ;;  %3721 = vmatprep.subr.bf16.mxu1 %v4260_v0 }
  0x89   : > { %3706 = vmatmul.mubr.msk.bf16.vlgmr.msra.gmra.mrb[20].mxu0 %vm323_vm2, %v317_v49  ;;  %3712 = vmatmul.mubr.msk.bf16.vlgmr.msra.gmra.mrb[20].mxu1 %vm323_vm2, %v318_v50  ;;  %v1840_v49 = vpack.c.bf16 %v235_v47, %v235_v47  ;;  %v236_v50 = vld [vmem:[%s4441_s6 + $0x28] sm:$0xf] }
  0x8a   : > { %3716 = vmatpush3.bf16.msra.mxu0 %v4560_v51  ;;  %3722 = vmatpush3.bf16.msra.mxu1 %v4563_v52  ;;  %v1841_v54 = vpack.c.bf16 %v236_v50, %v236_v50  ;;  %v270_v50 = vld [vmem:[%s4441_s6 + $0xb0] sm:$0xf] }
  0x8b   : > { %3717 = vmatprep.mubr.msk.bf16.mxu0 %vm4261_vm0, %v4260_v0  ;;  %3723 = vmatprep.mubr.msk.bf16.mxu1 %vm4261_vm0, %v4260_v0 }
  0x8c   : > { %3727 = vmatprep.subr.bf16.mxu0 %v4260_v0  ;;  %3733 = vmatprep.subr.bf16.mxu1 %v4260_v0 }
  0x91   : > { %3718 = vmatmul.mubr.msk.bf16.vlgmr.msra.gmra.mrb[24].mxu0 %vm323_vm2, %v319_v57  ;;  %3724 = vmatmul.mubr.msk.bf16.vlgmr.msra.gmra.mrb[24].mxu1 %vm323_vm2, %v320_v58  ;;  %v251_v57 = vld [vmem:[%s4441_s6 + $0x64] sm:$0xf]  ;;  %v1843_v58 = vpack.c.bf16 %v250_v56, %v250_v56 }
  0x92   : > { %3728 = vmatpush3.bf16.msra.mxu0 %v4578_v59  ;;  %3734 = vmatpush3.bf16.msra.mxu1 %v4581_v60  ;;  %v1844_v61 = vpack.c.bf16 %v251_v57, %v251_v57 }
  0x93   : > { %3729 = vmatprep.mubr.msk.bf16.mxu0 %vm4261_vm0, %v4260_v0  ;;  %3735 = vmatprep.mubr.msk.bf16.mxu1 %vm4261_vm0, %v4260_v0 }
  0x94   : > { %3739 = vmatprep.subr.bf16.mxu0 %v4260_v0  ;;  %3745 = vmatprep.subr.bf16.mxu1 %v4260_v0 }
  0x99   : > { %3730 = vmatmul.mubr.msk.bf16.vlgmr.msra.gmra.mrb[28].mxu0 %vm323_vm2, %v321_v63  ;;  %3736 = vmatmul.mubr.msk.bf16.vlgmr.msra.gmra.mrb[28].mxu1 %vm323_vm2, %v322_v1  ;;  %v253_v63 = vld [vmem:[%s4441_s6 + $0x6c] sm:$0xf]  ;;  %v1845_v1 = vpack.c.bf16 %v252_v62, %v252_v62 }
  0x9a   : > { %3740 = vmatpush3.bf16.msra.mxu0 %v4459_v4  ;;  %3746 = vmatpush3.bf16.msra.mxu1 %v4462_v5  ;;  %v1846_v2 = vpack.c.bf16 %v253_v63, %v253_v63 }
  0x9b   : > { %3741 = vmatprep.mubr.msk.bf16.mxu0 %vm4261_vm0, %v4260_v0  ;;  %3747 = vmatprep.mubr.msk.bf16.mxu1 %vm4261_vm0, %v4260_v0 }
  0x9c   : > { %3751 = vmatprep.subr.bf16.mxu0 %v4260_v0  ;;  %3757 = vmatprep.subr.bf16.mxu1 %v4260_v0 }
  0xa1   : > { %3742 = vmatmul.mubr.msk.bf16.vlgmr.msra.gmra.mrb[32].mxu0 %vm323_vm2, %v1101_v6  ;;  %3748 = vmatmul.mubr.msk.bf16.vlgmr.msra.gmra.mrb[32].mxu1 %vm323_vm2, %v1102_v7  ;;  %v267_v6 = vld [vmem:[%s4441_s6 + $0xa4] sm:$0xf]  ;;  %v1847_v7 = vpack.c.bf16 %v266_v3, %v266_v3 }
  0xa2   : > { %3752 = vmatpush3.bf16.msra.mxu0 %v4469_v11  ;;  %3758 = vmatpush3.bf16.msra.mxu1 %v4473_v12  ;;  %v1848_v8 = vpack.c.bf16 %v267_v6, %v267_v6 }
  0xa3   : > { %3753 = vmatprep.mubr.msk.bf16.mxu0 %vm4261_vm0, %v4260_v0  ;;  %3759 = vmatprep.mubr.msk.bf16.mxu1 %vm4261_vm0, %v4260_v0 }
  0xa4   : > { %3763 = vmatprep.subr.bf16.mxu0 %v4260_v0  ;;  %3769 = vmatprep.subr.bf16.mxu1 %v4260_v0 }
  0xa9   : > { %3754 = vmatmul.mubr.msk.bf16.vlgmr.msra.gmra.mrb[36].mxu0 %vm323_vm2, %v1103_v10  ;;  %3760 = vmatmul.mubr.msk.bf16.vlgmr.msra.gmra.mrb[36].mxu1 %vm323_vm2, %v1104_v13  ;;  %v269_v10 = vld [vmem:[%s4441_s6 + $0xac] sm:$0xf]  ;;  %v1849_v13 = vpack.c.bf16 %v268_v9, %v268_v9 }
  0xaa   : > { %3764 = vmatpush3.bf16.msra.mxu0 %v4488_v19  ;;  %3770 = vmatpush3.bf16.msra.mxu1 %v4491_v20  ;;  %v1850_v14 = vpack.c.bf16 %v269_v10, %v269_v10 }
  0xab   : > { %3765 = vmatprep.mubr.msk.bf16.mxu0 %vm4261_vm0, %v4260_v0  ;;  %3771 = vmatprep.mubr.msk.bf16.mxu1 %vm4261_vm0, %v4260_v0 }
  0xac   : > { %3775 = vmatprep.subr.bf16.mxu0 %v4260_v0  ;;  %3781 = vmatprep.subr.bf16.mxu1 %v4260_v0 }
  0xb1   : > { %3766 = vmatmul.mubr.msk.bf16.vlgmr.msra.gmra.mrb[40].mxu0 %vm323_vm2, %v1105_v16  ;;  %3772 = vmatmul.mubr.msk.bf16.vlgmr.msra.gmra.mrb[40].mxu1 %vm323_vm2, %v1106_v17  ;;  %v283_v16 = vld [vmem:[%s4441_s6 + $0xe4] sm:$0xf]  ;;  %v1851_v17 = vpack.c.bf16 %v282_v15, %v282_v15 }
  0xb2   : > { %3776 = vmatpush3.bf16.msra.mxu0 %v4506_v27  ;;  %3782 = vmatpush3.bf16.msra.mxu1 %v4509_v28  ;;  %v1852_v18 = vpack.c.bf16 %v283_v16, %v283_v16 }
  0xb3   : > { %3777 = vmatprep.mubr.msk.bf16.mxu0 %vm4261_vm0, %v4260_v0  ;;  %3783 = vmatprep.mubr.msk.bf16.mxu1 %vm4261_vm0, %v4260_v0 }
  0xb4   : > { %3787 = vmatprep.subr.bf16.mxu0 %v4260_v0  ;;  %3793 = vmatprep.subr.bf16.mxu1 %v4260_v0 }
  0xb9   : > { %3778 = vmatmul.mubr.msk.bf16.vlgmr.msra.gmra.mrb[44].mxu0 %vm323_vm2, %v1107_v22  ;;  %3784 = vmatmul.mubr.msk.bf16.vlgmr.msra.gmra.mrb[44].mxu1 %vm323_vm2, %v1108_v23  ;;  %v285_v22 = vld [vmem:[%s4441_s6 + $0xec] sm:$0xf]  ;;  %v1853_v23 = vpack.c.bf16 %v284_v21, %v284_v21 }
  0xba   : > { %3788 = vmatpush3.bf16.msra.mxu0 %v4524_v35  ;;  %3794 = vmatpush3.bf16.msra.mxu1 %v4527_v36  ;;  %v1854_v24 = vpack.c.bf16 %v285_v22, %v285_v22 }
  0xbb   : > { %3789 = vmatprep.mubr.msk.bf16.mxu0 %vm4261_vm0, %v4260_v0  ;;  %3795 = vmatprep.mubr.msk.bf16.mxu1 %vm4261_vm0, %v4260_v0 }
  0xbc   : > { %3799 = vmatprep.subr.bf16.mxu0 %v4260_v0  ;;  %3805 = vmatprep.subr.bf16.mxu1 %v4260_v0 }
  0xc1   : > { %3790 = vmatmul.mubr.msk.bf16.vlgmr.msra.gmra.mrb[48].mxu0 %vm323_vm2, %v1109_v26  ;;  %3796 = vmatmul.mubr.msk.bf16.vlgmr.msra.gmra.mrb[48].mxu1 %vm323_vm2, %v1110_v29  ;;  %v239_v26 = vld [vmem:[%s4441_s6 + $0x34] sm:$0xf]  ;;  %v2577_v29 = vpack.c.bf16 %v238_v25, %v238_v25  ;;  %v286_v25 = vld [vmem:[%s4441_s6 + $0xf0] sm:$0xf] }
  0xc2   : > { %3800 = vmatpush3.bf16.msra.mxu0 %v4542_v43  ;;  %3806 = vmatpush3.bf16.msra.mxu1 %v4545_v44  ;;  %v2578_v30 = vpack.c.bf16 %v239_v26, %v239_v26  ;;  %v287_v26 = vld [vmem:[%s4441_s6 + $0xf4] sm:$0xf] }
  0xc3   : > { %3801 = vmatprep.mubr.msk.bf16.mxu0 %vm4261_vm0, %v4260_v0  ;;  %3807 = vmatprep.mubr.msk.bf16.mxu1 %vm4261_vm0, %v4260_v0 }
  0xc4   : > { %3811 = vmatprep.subr.bf16.mxu0 %v4260_v0  ;;  %3817 = vmatprep.subr.bf16.mxu1 %v4260_v0 }
  0xc9   : > { %3802 = vmatmul.mubr.msk.bf16.vlgmr.msra.gmra.mrb[52].mxu0 %vm323_vm2, %v1111_v32  ;;  %3808 = vmatmul.mubr.msk.bf16.vlgmr.msra.gmra.mrb[52].mxu1 %vm323_vm2, %v1112_v33 }
  0xca   : > { %3812 = vmatpush3.bf16.msra.mxu0 %v4560_v51  ;;  %3818 = vmatpush3.bf16.msra.mxu1 %v4563_v52 }
  0xcb   : > { %3813 = vmatprep.mubr.msk.bf16.mxu0 %vm4261_vm0, %v4260_v0  ;;  %3819 = vmatprep.mubr.msk.bf16.mxu1 %vm4261_vm0, %v4260_v0 }
  0xcc   : > { %3823 = vmatprep.subr.bf16.mxu0 %v4260_v0  ;;  %3829 = vmatprep.subr.bf16.mxu1 %v4260_v0 }
  0xd1   : > { %3814 = vmatmul.mubr.msk.bf16.vlgmr.msra.gmra.mrb[56].mxu0 %vm323_vm2, %v1113_v38  ;;  %3820 = vmatmul.mubr.msk.bf16.vlgmr.msra.gmra.mrb[56].mxu1 %vm323_vm2, %v1114_v39 }
  0xd2   : > { %3824 = vmatpush3.bf16.msra.mxu0 %v4578_v59  ;;  %3830 = vmatpush3.bf16.msra.mxu1 %v4581_v60 }
  0xd3   : > { %3825 = vmatprep.mubr.msk.bf16.mxu0 %vm4261_vm0, %v4260_v0  ;;  %3831 = vmatprep.mubr.msk.bf16.mxu1 %vm4261_vm0, %v4260_v0 }
  0xd4   : > { %3835 = vmatprep.subr.bf16.mxu0 %v4260_v0  ;;  %3841 = vmatprep.subr.bf16.mxu1 %v4260_v0 }
  0xd9   : > { %3826 = vmatmul.mubr.msk.bf16.vlgmr.msra.gmra.mrb[60].mxu0 %vm323_vm2, %v1115_v42  ;;  %3832 = vmatmul.mubr.msk.bf16.vlgmr.msra.gmra.mrb[60].mxu1 %vm323_vm2, %v1116_v45 }
  0xda   : > { %3836 = vmatpush3.bf16.msra.mxu0 %v4459_v4  ;;  %3842 = vmatpush3.bf16.msra.mxu1 %v4462_v5 }
  0xdb   : > { %3837 = vmatprep.mubr.msk.bf16.mxu0 %vm4261_vm0, %v4260_v0  ;;  %3843 = vmatprep.mubr.msk.bf16.mxu1 %vm4261_vm0, %v4260_v0 }
  0xdc   : > { %3847 = vmatprep.subr.bf16.mxu0 %v4260_v0  ;;  %3853 = vmatprep.subr.bf16.mxu1 %v4260_v0 }
  0xe1   : > { %3838 = vmatmul.mubr.msk.bf16.vlgmr.msra.gmra.mrb[64].mxu0 %vm323_vm2, %v1839_v48  ;;  %3844 = vmatmul.mubr.msk.bf16.vlgmr.msra.gmra.mrb[64].mxu1 %vm323_vm2, %v1840_v49 }
  0xe2   : > { %3848 = vmatpush3.bf16.msra.mxu0 %v4469_v11  ;;  %3854 = vmatpush3.bf16.msra.mxu1 %v4473_v12 }
  0xe3   : > { %3849 = vmatprep.mubr.msk.bf16.mxu0 %vm4261_vm0, %v4260_v0  ;;  %3855 = vmatprep.mubr.msk.bf16.mxu1 %vm4261_vm0, %v4260_v0 }
  0xe4   : > { %3859 = vmatprep.subr.bf16.mxu0 %v4260_v0  ;;  %3865 = vmatprep.subr.bf16.mxu1 %v4260_v0 }
  0xe9   : > { %3850 = vmatmul.mubr.msk.bf16.vlgmr.msra.gmra.mrb[68].mxu0 %vm323_vm2, %v1841_v54  ;;  %3856 = vmatmul.mubr.msk.bf16.vlgmr.msra.gmra.mrb[68].mxu1 %vm323_vm2, %v1842_v55 }
  0xea   : > { %3860 = vmatpush3.bf16.msra.mxu0 %v4488_v19  ;;  %3866 = vmatpush3.bf16.msra.mxu1 %v4491_v20 }
  0xeb   : > { %3861 = vmatprep.mubr.msk.bf16.mxu0 %vm4261_vm0, %v4260_v0  ;;  %3867 = vmatprep.mubr.msk.bf16.mxu1 %vm4261_vm0, %v4260_v0 }
  0xec   : > { %3871 = vmatprep.subr.bf16.mxu0 %v4260_v0  ;;  %3877 = vmatprep.subr.bf16.mxu1 %v4260_v0 }
  0xf1   : > { %3862 = vmatmul.mubr.msk.bf16.vlgmr.msra.gmra.mrb[72].mxu0 %vm323_vm2, %v1843_v58  ;;  %3868 = vmatmul.mubr.msk.bf16.vlgmr.msra.gmra.mrb[72].mxu1 %vm323_vm2, %v1844_v61  ;;  %v2585_v58 = vpack.c.bf16 %v270_v50, %v270_v50  ;;  %v2586_v61 = vpack.c.bf16 %v271_v53, %v271_v53 }
  0xf2   : > { %3872 = vmatpush3.bf16.msra.mxu0 %v4506_v27  ;;  %3878 = vmatpush3.bf16.msra.mxu1 %v4509_v28 }
  0xf3   : > { %3873 = vmatprep.mubr.msk.bf16.mxu0 %vm4261_vm0, %v4260_v0  ;;  %3879 = vmatprep.mubr.msk.bf16.mxu1 %vm4261_vm0, %v4260_v0 }
  0xf4   : > { %3883 = vmatprep.subr.bf16.mxu0 %v4260_v0  ;;  %3889 = vmatprep.subr.bf16.mxu1 %v4260_v0 }
  0xf9   : > { %3874 = vmatmul.mubr.msk.bf16.vlgmr.msra.gmra.mrb[76].mxu0 %vm323_vm2, %v1845_v1  ;;  %3880 = vmatmul.mubr.msk.bf16.vlgmr.msra.gmra.mrb[76].mxu1 %vm323_vm2, %v1846_v2 }
  0xfa   : > { %3884 = vmatpush3.bf16.msra.mxu0 %v4524_v35  ;;  %3890 = vmatpush3.bf16.msra.mxu1 %v4527_v36 }
  0xfb   : > { %3885 = vmatprep.mubr.msk.bf16.mxu0 %vm4261_vm0, %v4260_v0  ;;  %3891 = vmatprep.mubr.msk.bf16.mxu1 %vm4261_vm0, %v4260_v0 }
  0xfc   : > { %3895 = vmatprep.subr.bf16.mxu0 %v4260_v0  ;;  %3901 = vmatprep.subr.bf16.mxu1 %v4260_v0 }
 0x101   : > { %3886 = vmatmul.mubr.msk.bf16.vlgmr.msra.gmra.mrb[80].mxu0 %vm323_vm2, %v1847_v7  ;;  %3892 = vmatmul.mubr.msk.bf16.vlgmr.msra.gmra.mrb[80].mxu1 %vm323_vm2, %v1848_v8  ;;  %v272_v7 = vld [vmem:[%s4441_s6 + $0xb8] sm:$0xf]  ;;  %v273_v8 = vld [vmem:[%s4441_s6 + $0xbc] sm:$0xf] }
 0x102   : > { %3896 = vmatpush3.bf16.msra.mxu0 %v4542_v43  ;;  %3902 = vmatpush3.bf16.msra.mxu1 %v4545_v44  ;;  %v2587_v15 = vpack.c.bf16 %v272_v7, %v272_v7  ;;  %v2588_v16 = vpack.c.bf16 %v273_v8, %v273_v8 }
 0x103   : > { %3897 = vmatprep.mubr.msk.bf16.mxu0 %vm4261_vm0, %v4260_v0  ;;  %3903 = vmatprep.mubr.msk.bf16.mxu1 %vm4261_vm0, %v4260_v0 }
 0x104   : > { %3907 = vmatprep.subr.bf16.mxu0 %v4260_v0  ;;  %3913 = vmatprep.subr.bf16.mxu1 %v4260_v0 }
 0x109   : > { %3898 = vmatmul.mubr.msk.bf16.vlgmr.msra.gmra.mrb[84].mxu0 %vm323_vm2, %v1849_v13  ;;  %3904 = vmatmul.mubr.msk.bf16.vlgmr.msra.gmra.mrb[84].mxu1 %vm323_vm2, %v1850_v14 }
 0x10a   : > { %3908 = vmatpush3.bf16.msra.mxu0 %v4560_v51  ;;  %3914 = vmatpush3.bf16.msra.mxu1 %v4563_v52 }
 0x10b   : > { %3909 = vmatprep.mubr.msk.bf16.mxu0 %vm4261_vm0, %v4260_v0  ;;  %3915 = vmatprep.mubr.msk.bf16.mxu1 %vm4261_vm0, %v4260_v0 }
 0x10c   : > { %3919 = vmatprep.subr.bf16.mxu0 %v4260_v0  ;;  %3925 = vmatprep.subr.bf16.mxu1 %v4260_v0 }
 0x111   : > { %3910 = vmatmul.mubr.msk.bf16.vlgmr.msra.gmra.mrb[88].mxu0 %vm323_vm2, %v1851_v17  ;;  %3916 = vmatmul.mubr.msk.bf16.vlgmr.msra.gmra.mrb[88].mxu1 %vm323_vm2, %v1852_v18 }
 0x112   : > { %3920 = vmatpush3.bf16.msra.mxu0 %v4578_v59  ;;  %3926 = vmatpush3.bf16.msra.mxu1 %v4581_v60 }
 0x113   : > { %3921 = vmatprep.mubr.msk.bf16.mxu0 %vm4261_vm0, %v4260_v0  ;;  %3927 = vmatprep.mubr.msk.bf16.mxu1 %vm4261_vm0, %v4260_v0 }
 0x114   : > { %3931 = vmatprep.subr.bf16.mxu0 %v4260_v0  ;;  %3937 = vmatprep.subr.bf16.mxu1 %v4260_v0 }
 0x119   : > { %3922 = vmatmul.mubr.msk.bf16.vlgmr.msra.gmra.mrb[92].mxu0 %vm323_vm2, %v1853_v23  ;;  %3928 = vmatmul.mubr.msk.bf16.vlgmr.msra.gmra.mrb[92].mxu1 %vm323_vm2, %v1854_v24 }
 0x11a   : > { %3932 = vmatpush3.bf16.msra.mxu0 %v4459_v4  ;;  %3938 = vmatpush3.bf16.msra.mxu1 %v4462_v5  ;;  %v240_v4 = vld [vmem:[%s4441_s6 + $0x38] sm:$0xf]  ;;  %v241_v5 = vld [vmem:[%s4441_s6 + $0x3c] sm:$0xf] }
 0x11b   : > { %3933 = vmatprep.mubr.msk.bf16.mxu0 %vm4261_vm0, %v4260_v0  ;;  %3939 = vmatprep.mubr.msk.bf16.mxu1 %vm4261_vm0, %v4260_v0  ;;  %v2579_v31 = vpack.c.bf16 %v240_v4, %v240_v4  ;;  %v2580_v32 = vpack.c.bf16 %v241_v5, %v241_v5 }
 0x11c   : > { %3943 = vmatprep.subr.bf16.mxu0 %v4260_v0  ;;  %3949 = vmatprep.subr.bf16.mxu1 %v4260_v0 }
 0x121   : > { %3934 = vmatmul.mubr.msk.bf16.vlgmr.msra.gmra.mrb[96].mxu0 %vm323_vm2, %v2577_v29  ;;  %3940 = vmatmul.mubr.msk.bf16.vlgmr.msra.gmra.mrb[96].mxu1 %vm323_vm2, %v2578_v30 }
 0x122   : > { %3944 = vmatpush3.bf16.msra.mxu0 %v4469_v11  ;;  %3950 = vmatpush3.bf16.msra.mxu1 %v4473_v12  ;;  %v254_v11 = vld [vmem:[%s4441_s6 + $0x70] sm:$0xf]  ;;  %v255_v12 = vld [vmem:[%s4441_s6 + $0x74] sm:$0xf] }
 0x123   : > { %3945 = vmatprep.mubr.msk.bf16.mxu0 %vm4261_vm0, %v4260_v0  ;;  %3951 = vmatprep.mubr.msk.bf16.mxu1 %vm4261_vm0, %v4260_v0  ;;  %v2581_v33 = vpack.c.bf16 %v254_v11, %v254_v11  ;;  %v2582_v34 = vpack.c.bf16 %v255_v12, %v255_v12 }
 0x124   : > { %3955 = vmatprep.subr.bf16.mxu0 %v4260_v0  ;;  %3961 = vmatprep.subr.bf16.mxu1 %v4260_v0 }
 0x129   : > { %3946 = vmatmul.mubr.msk.bf16.vlgmr.msra.gmra.mrb[100].mxu0 %vm323_vm2, %v2579_v31  ;;  %3952 = vmatmul.mubr.msk.bf16.vlgmr.msra.gmra.mrb[100].mxu1 %vm323_vm2, %v2580_v32  ;;  %v2589_v31 = vpack.c.bf16 %v286_v25, %v286_v25  ;;  %v2590_v32 = vpack.c.bf16 %v287_v26, %v287_v26  ;;  %v4903_v26 = vld [vmem:[%s5021_s2] ss:$0 sm:$0xff] }
 0x12a   : > { %3956 = vmatpush3.bf16.msra.mxu0 %v4488_v19  ;;  %3962 = vmatpush3.bf16.msra.mxu1 %v4491_v20  ;;  %v256_v19 = vld [vmem:[%s4441_s6 + $0x78] sm:$0xf]  ;;  %v257_v20 = vld [vmem:[%s4441_s6 + $0x7c] sm:$0xf] }
 0x12b   : > { %3957 = vmatprep.mubr.msk.bf16.mxu0 %vm4261_vm0, %v4260_v0  ;;  %3963 = vmatprep.mubr.msk.bf16.mxu1 %vm4261_vm0, %v4260_v0  ;;  %v2583_v41 = vpack.c.bf16 %v256_v19, %v256_v19  ;;  %v2584_v42 = vpack.c.bf16 %v257_v20, %v257_v20 }
 0x12c   : > { %3967 = vmatprep.subr.bf16.mxu0 %v4260_v0  ;;  %3973 = vmatprep.subr.bf16.mxu1 %v4260_v0 }
 0x131   : > { %3958 = vmatmul.mubr.msk.bf16.vlgmr.msra.gmra.mrb[104].mxu0 %vm323_vm2, %v2581_v33  ;;  %3964 = vmatmul.mubr.msk.bf16.vlgmr.msra.gmra.mrb[104].mxu1 %vm323_vm2, %v2582_v34 }
 0x132   : > { %3968 = vmatpush3.bf16.msra.mxu0 %v4506_v27  ;;  %3974 = vmatpush3.bf16.msra.mxu1 %v4509_v28 }
 0x133   : > { %3969 = vmatprep.mubr.msk.bf16.mxu0 %vm4261_vm0, %v4260_v0  ;;  %3975 = vmatprep.mubr.msk.bf16.mxu1 %vm4261_vm0, %v4260_v0 }
 0x134   : > { %v365_v37 = vpop.f32.mrb[0].mxu0  ;;  %v411_v38 = vpop.f32.mrb[0].mxu1  ;;  %3979 = vmatprep.subr.bf16.mxu0 %v4260_v0  ;;  %3985 = vmatprep.subr.bf16.mxu1 %v4260_v0 }
 0x135   : > { %v1062_v27 = vsel %vm1061_vm3, %v365_v37, 0.0  ;;  %v1063_v28 = vsel %vm1061_vm3, %v411_v38, 0.0  ;;  %v3647_v39 = vpop.f32.mrb[1].mxu0  ;;  %v3653_v40 = vpop.f32.mrb[1].mxu1  ;;  %v288_v37 = vld [vmem:[%s4441_s6 + $0xf8] sm:$0xf] }
 0x136   : > { %v1064_v45 = vadd.f32 %v1063_v28, %v1062_v27  ;;  %v368_v46 = vpop.f32.mrb[2].mxu0  ;;  %v414_v47 = vpop.f32.mrb[2].mxu1  ;;  %v289_v38 = vld [vmem:[%s4441_s6 + $0xfc] sm:$0xf] }
 0x137   : > { %v3648_v48 = vpop.f32.mrb[3].mxu0  ;;  %v3654_v49 = vpop.f32.mrb[3].mxu1 }
 0x139   : > { %3970 = vmatmul.mubr.msk.bf16.vlgmr.msra.gmra.mrb[108].mxu0 %vm323_vm2, %v2583_v41  ;;  %3976 = vmatmul.mubr.msk.bf16.vlgmr.msra.gmra.mrb[108].mxu1 %vm323_vm2, %v2584_v42 }
 0x13a   : > { %3980 = vmatpush3.bf16.msra.mxu0 %v4524_v35  ;;  %3986 = vmatpush3.bf16.msra.mxu1 %v4527_v36 }
 0x13b   : > { %3981 = vmatprep.mubr.msk.bf16.mxu0 %vm4261_vm0, %v4260_v0  ;;  %3987 = vmatprep.mubr.msk.bf16.mxu1 %vm4261_vm0, %v4260_v0 }
 0x13c   : > { %v457_v54 = vpop.f32.mrb[4].mxu0  ;;  %v503_v55 = vpop.f32.mrb[4].mxu1  ;;  %3991 = vmatprep.subr.bf16.mxu0 %v4260_v0  ;;  %3997 = vmatprep.subr.bf16.mxu1 %v4260_v0 }
 0x13d   : > { %v1065_v56 = vsel %vm1061_vm3, %v457_v54, 0.0  ;;  %v1067_v35 = vsel %vm1061_vm3, %v503_v55, 0.0  ;;  %v3659_v36 = vpop.f32.mrb[5].mxu0  ;;  %v3665_v57 = vpop.f32.mrb[5].mxu1 }
 0x13e   : > { %v1066_v62 = vadd.f32 %v1065_v56, %v1064_v45  ;;  %v460_v63 = vpop.f32.mrb[6].mxu0  ;;  %v506_v1 = vpop.f32.mrb[6].mxu1  ;;  %v2591_v45 = vpack.c.bf16 %v288_v37, %v288_v37 }
 0x13f   : > { %v3660_v2 = vpop.f32.mrb[7].mxu0  ;;  %v3666_v3 = vpop.f32.mrb[7].mxu1 }
 0x140   : > { %v1068_v6 = vadd.f32 %v1067_v35, %v1066_v62 }
 0x141   : > { %3982 = vmatmul.mubr.msk.bf16.vlgmr.msra.gmra.mrb[112].mxu0 %vm323_vm2, %v2585_v58  ;;  %3988 = vmatmul.mubr.msk.bf16.vlgmr.msra.gmra.mrb[112].mxu1 %vm323_vm2, %v2586_v61 }
 0x142   : > { %3992 = vmatpush3.bf16.msra.mxu0 %v4542_v43  ;;  %3998 = vmatpush3.bf16.msra.mxu1 %v4545_v44 }
 0x143   : > { %3993 = vmatprep.mubr.msk.bf16.mxu0 %vm4261_vm0, %v4260_v0  ;;  %3999 = vmatprep.mubr.msk.bf16.mxu1 %vm4261_vm0, %v4260_v0 }
 0x144   : > { %v549_v9 = vpop.f32.mrb[8].mxu0  ;;  %v595_v10 = vpop.f32.mrb[8].mxu1  ;;  %4003 = vmatprep.subr.bf16.mxu0 %v4260_v0  ;;  %4009 = vmatprep.subr.bf16.mxu1 %v4260_v0 }
 0x145   : > { %v1069_v13 = vsel %vm1061_vm3, %v549_v9, 0.0  ;;  %v1071_v43 = vsel %vm1061_vm3, %v595_v10, 0.0  ;;  %v3671_v44 = vpop.f32.mrb[9].mxu0  ;;  %v3677_v14 = vpop.f32.mrb[9].mxu1 }
 0x146   : > { %v1070_v17 = vadd.f32 %v1069_v13, %v1068_v6  ;;  %v552_v18 = vpop.f32.mrb[10].mxu0  ;;  %v598_v21 = vpop.f32.mrb[10].mxu1 }
 0x147   : > { %v3672_v22 = vpop.f32.mrb[11].mxu0  ;;  %v3678_v23 = vpop.f32.mrb[11].mxu1 }
 0x148   : > { %v1072_v24 = vadd.f32 %v1071_v43, %v1070_v17 }
 0x149   : > { %3994 = vmatmul.mubr.msk.bf16.vlgmr.msra.gmra.mrb[116].mxu0 %vm323_vm2, %v2587_v15  ;;  %4000 = vmatmul.mubr.msk.bf16.vlgmr.msra.gmra.mrb[116].mxu1 %vm323_vm2, %v2588_v16 }
 0x14a   : > { %4004 = vmatpush3.bf16.msra.mxu0 %v4560_v51  ;;  %4010 = vmatpush3.bf16.msra.mxu1 %v4563_v52 }
 0x14b   : > { %4005 = vmatprep.mubr.msk.bf16.mxu0 %vm4261_vm0, %v4260_v0  ;;  %4011 = vmatprep.mubr.msk.bf16.mxu1 %vm4261_vm0, %v4260_v0 }
 0x14c   : > { %v641_v29 = vpop.f32.mrb[12].mxu0  ;;  %v687_v30 = vpop.f32.mrb[12].mxu1  ;;  %4015 = vmatprep.subr.bf16.mxu0 %v4260_v0  ;;  %4021 = vmatprep.subr.bf16.mxu1 %v4260_v0 }
 0x14d   : > { %v1073_v4 = vsel %vm1061_vm3, %v641_v29, 0.0  ;;  %v1075_v51 = vsel %vm1061_vm3, %v687_v30, 0.0  ;;  %v3683_v52 = vpop.f32.mrb[13].mxu0  ;;  %v3689_v5 = vpop.f32.mrb[13].mxu1 }
 0x14e   : > { %v1074_v11 = vadd.f32 %v1073_v4, %v1072_v24  ;;  %v644_v12 = vpop.f32.mrb[14].mxu0  ;;  %v690_v33 = vpop.f32.mrb[14].mxu1 }
 0x14f   : > { %v3684_v34 = vpop.f32.mrb[15].mxu0  ;;  %v3690_v19 = vpop.f32.mrb[15].mxu1 }
 0x150   : > { %v1076_v20 = vadd.f32 %v1075_v51, %v1074_v11 }
 0x151   : > { %4006 = vmatmul.mubr.msk.bf16.vlgmr.msra.gmra.mrb[120].mxu0 %vm323_vm2, %v2589_v31  ;;  %4012 = vmatmul.mubr.msk.bf16.vlgmr.msra.gmra.mrb[120].mxu1 %vm323_vm2, %v2590_v32 }
 0x152   : > { %4016 = vmatpush3.bf16.msra.mxu0 %v4578_v59  ;;  %4022 = vmatpush3.bf16.msra.mxu1 %v4581_v60  ;;  %v2592_v59 = vpack.c.bf16 %v289_v38, %v289_v38 }
 0x153   : > { %4017 = vmatprep.mubr.msk.bf16.mxu0 %vm4261_vm0, %v4260_v0  ;;  %4023 = vmatprep.mubr.msk.bf16.mxu1 %vm4261_vm0, %v4260_v0 }
 0x154   : > { %v733_v27 = vpop.f32.mrb[16].mxu0  ;;  %v779_v28 = vpop.f32.mrb[16].mxu1 }
 0x155   : > { %v1077_v39 = vsel %vm1061_vm3, %v733_v27, 0.0  ;;  %v1079_v40 = vsel %vm1061_vm3, %v779_v28, 0.0  ;;  %v3695_v41 = vpop.f32.mrb[17].mxu0  ;;  %v3701_v42 = vpop.f32.mrb[17].mxu1 }
 0x156   : > { %v1078_v46 = vadd.f32 %v1077_v39, %v1076_v20  ;;  %v736_v60 = vpop.f32.mrb[18].mxu0  ;;  %v782_v47 = vpop.f32.mrb[18].mxu1 }
 0x157   : > { %v3696_v48 = vpop.f32.mrb[19].mxu0  ;;  %v3702_v49 = vpop.f32.mrb[19].mxu1 }
 0x158   : > { %v1080_v50 = vadd.f32 %v1079_v40, %v1078_v46 }
 0x159   : > { %4018 = vmatmul.mubr.msk.bf16.vlgmr.msra.gmra.mrb[124].mxu0 %vm323_vm2, %v2591_v45  ;;  %4024 = vmatmul.mubr.msk.bf16.vlgmr.msra.gmra.mrb[124].mxu1 %vm323_vm2, %v2592_v59 }
 0x15c   : > { %v825_v0 = vpop.f32.mrb[20].mxu0  ;;  %v871_v53 = vpop.f32.mrb[20].mxu1 }
 0x15d   : > { %v1081_v54 = vsel %vm1061_vm3, %v825_v0, 0.0  ;;  %v1083_v55 = vsel %vm1061_vm3, %v871_v53, 0.0  ;;  %v3707_v56 = vpop.f32.mrb[21].mxu0  ;;  %v3713_v35 = vpop.f32.mrb[21].mxu1 }
 0x15e   : > { %v1082_v36 = vadd.f32 %v1081_v54, %v1080_v50  ;;  %v828_v57 = vpop.f32.mrb[22].mxu0  ;;  %v874_v58 = vpop.f32.mrb[22].mxu1 }
 0x15f   : > { %v3708_v61 = vpop.f32.mrb[23].mxu0  ;;  %v3714_v62 = vpop.f32.mrb[23].mxu1 }
 0x160   : > { %v1084_v63 = vadd.f32 %v1083_v55, %v1082_v36 }
 0x164   : > { %v917_v1 = vpop.f32.mrb[24].mxu0  ;;  %v963_v2 = vpop.f32.mrb[24].mxu1 }
 0x165   : > { %v1085_v3 = vsel %vm1061_vm3, %v917_v1, 0.0  ;;  %v1087_v6 = vsel %vm1061_vm3, %v963_v2, 0.0  ;;  %v3719_v7 = vpop.f32.mrb[25].mxu0  ;;  %v3725_v8 = vpop.f32.mrb[25].mxu1 }
 0x166   : > { %v1086_v9 = vadd.f32 %v1085_v3, %v1084_v63  ;;  %v920_v10 = vpop.f32.mrb[26].mxu0  ;;  %v966_v13 = vpop.f32.mrb[26].mxu1 }
 0x167   : > { %v3720_v43 = vpop.f32.mrb[27].mxu0  ;;  %v3726_v44 = vpop.f32.mrb[27].mxu1 }
 0x168   : > { %v1088_v14 = vadd.f32 %v1087_v6, %v1086_v9 }
 0x16c   : > { %v1009_v15 = vpop.f32.mrb[28].mxu0  ;;  %v1055_v16 = vpop.f32.mrb[28].mxu1 }
 0x16d   : > { %v1089_v17 = vsel %vm1061_vm3, %v1009_v15, 0.0  ;;  %v1091_v18 = vsel %vm1061_vm3, %v1055_v16, 0.0  ;;  %v3731_v21 = vpop.f32.mrb[29].mxu0  ;;  %v3737_v22 = vpop.f32.mrb[29].mxu1 }
 0x16e   : > { %v1090_v23 = vadd.f32 %v1089_v17, %v1088_v14  ;;  %v1012_v24 = vpop.f32.mrb[30].mxu0  ;;  %v1058_v25 = vpop.f32.mrb[30].mxu1 }
 0x16f   : > { %v3732_v29 = vpop.f32.mrb[31].mxu0  ;;  %v3738_v30 = vpop.f32.mrb[31].mxu1 }
 0x170   : > { %v1092_v4 = vadd.f32 %v1091_v18, %v1090_v23 }
 0x172   : > { %v1099_v51 = vadd.f32 %v4903_v26, %v1092_v4 }
 0x174   : > { %1100 = vst [vmem:[%s4906_s9] sm:$0xf] %v1099_v51  ;;  %v1154_v52 = vpop.f32.mrb[32].mxu0  ;;  %v1197_v5 = vpop.f32.mrb[32].mxu1 }
 0x175   : > { %v1805_v31 = vsel %vm1061_vm3, %v1154_v52, 0.0  ;;  %v1806_v32 = vsel %vm1061_vm3, %v1197_v5, 0.0  ;;  %v3743_v11 = vpop.f32.mrb[33].mxu0  ;;  %v3749_v12 = vpop.f32.mrb[33].mxu1 }
 0x176   : > { %v1807_v33 = vadd.f32 %v1806_v32, %v1805_v31  ;;  %v1157_v34 = vpop.f32.mrb[34].mxu0  ;;  %v1200_v19 = vpop.f32.mrb[34].mxu1 }
 0x177   : > { %v3744_v20 = vpop.f32.mrb[35].mxu0  ;;  %v3750_v37 = vpop.f32.mrb[35].mxu1 }
 0x17c   : > { %v1240_v38 = vpop.f32.mrb[36].mxu0  ;;  %v1283_v27 = vpop.f32.mrb[36].mxu1 }
 0x17d   : > { %v1808_v28 = vsel %vm1061_vm3, %v1240_v38, 0.0  ;;  %v1810_v39 = vsel %vm1061_vm3, %v1283_v27, 0.0  ;;  %v3755_v40 = vpop.f32.mrb[37].mxu0  ;;  %v3761_v41 = vpop.f32.mrb[37].mxu1 }
 0x17e   : > { %v1809_v42 = vadd.f32 %v1808_v28, %v1807_v33  ;;  %v1243_v45 = vpop.f32.mrb[38].mxu0  ;;  %v1286_v59 = vpop.f32.mrb[38].mxu1 }
 0x17f   : > { %v3756_v46 = vpop.f32.mrb[39].mxu0  ;;  %v3762_v60 = vpop.f32.mrb[39].mxu1 }
 0x180   : > { %v1811_v47 = vadd.f32 %v1810_v39, %v1809_v42 }
 0x184   : > { %v1326_v48 = vpop.f32.mrb[40].mxu0  ;;  %v1369_v49 = vpop.f32.mrb[40].mxu1 }
 0x185   : > { %v1812_v50 = vsel %vm1061_vm3, %v1326_v48, 0.0  ;;  %v1814_v0 = vsel %vm1061_vm3, %v1369_v49, 0.0  ;;  %v3767_v53 = vpop.f32.mrb[41].mxu0  ;;  %v3773_v54 = vpop.f32.mrb[41].mxu1 }
 0x186   : > { %v1813_v55 = vadd.f32 %v1812_v50, %v1811_v47  ;;  %v1329_v56 = vpop.f32.mrb[42].mxu0  ;;  %v1372_v35 = vpop.f32.mrb[42].mxu1 }
 0x187   : > { %v3768_v36 = vpop.f32.mrb[43].mxu0  ;;  %v3774_v57 = vpop.f32.mrb[43].mxu1 }
 0x188   : > { %v1815_v58 = vadd.f32 %v1814_v0, %v1813_v55 }
 0x18c   : > { %v1412_v61 = vpop.f32.mrb[44].mxu0  ;;  %v1455_v62 = vpop.f32.mrb[44].mxu1 }
 0x18d   : > { %v1816_v63 = vsel %vm1061_vm3, %v1412_v61, 0.0  ;;  %v1818_v1 = vsel %vm1061_vm3, %v1455_v62, 0.0  ;;  %v3779_v2 = vpop.f32.mrb[45].mxu0  ;;  %v3785_v3 = vpop.f32.mrb[45].mxu1 }
 0x18e   : > { %v1817_v6 = vadd.f32 %v1816_v63, %v1815_v58  ;;  %v1415_v7 = vpop.f32.mrb[46].mxu0  ;;  %v1458_v8 = vpop.f32.mrb[46].mxu1 }
 0x18f   : > { %v3780_v9 = vpop.f32.mrb[47].mxu0  ;;  %v3786_v10 = vpop.f32.mrb[47].mxu1 }
 0x190   : > { %v1819_v13 = vadd.f32 %v1818_v1, %v1817_v6 }
 0x194   : > { %v1498_v43 = vpop.f32.mrb[48].mxu0  ;;  %v1541_v44 = vpop.f32.mrb[48].mxu1 }
 0x195   : > { %v1820_v14 = vsel %vm1061_vm3, %v1498_v43, 0.0  ;;  %v1822_v15 = vsel %vm1061_vm3, %v1541_v44, 0.0  ;;  %v3791_v16 = vpop.f32.mrb[49].mxu0  ;;  %v3797_v17 = vpop.f32.mrb[49].mxu1 }
 0x196   : > { %v1821_v18 = vadd.f32 %v1820_v14, %v1819_v13  ;;  %v1501_v21 = vpop.f32.mrb[50].mxu0  ;;  %v1544_v22 = vpop.f32.mrb[50].mxu1 }
 0x197   : > { %v3792_v23 = vpop.f32.mrb[51].mxu0  ;;  %v3798_v24 = vpop.f32.mrb[51].mxu1 }
 0x198   : > { %v1823_v25 = vadd.f32 %v1822_v15, %v1821_v18 }
 0x19c   : > { %v1584_v29 = vpop.f32.mrb[52].mxu0  ;;  %v1627_v30 = vpop.f32.mrb[52].mxu1 }
 0x19d   : > { %v1824_v4 = vsel %vm1061_vm3, %v1584_v29, 0.0  ;;  %v1826_v51 = vsel %vm1061_vm3, %v1627_v30, 0.0  ;;  %v3803_v52 = vpop.f32.mrb[53].mxu0  ;;  %v3809_v5 = vpop.f32.mrb[53].mxu1 }
 0x19e   : > { %v1825_v31 = vadd.f32 %v1824_v4, %v1823_v25  ;;  %v1587_v32 = vpop.f32.mrb[54].mxu0  ;;  %v1630_v11 = vpop.f32.mrb[54].mxu1 }
 0x19f   : > { %v3804_v12 = vpop.f32.mrb[55].mxu0  ;;  %v3810_v33 = vpop.f32.mrb[55].mxu1 }
 0x1a0   : > { %v1827_v34 = vadd.f32 %v1826_v51, %v1825_v31 }
 0x1a4   : > { %v1670_v19 = vpop.f32.mrb[56].mxu0  ;;  %v1713_v20 = vpop.f32.mrb[56].mxu1 }
 0x1a5   : > { %v1828_v37 = vsel %vm1061_vm3, %v1670_v19, 0.0  ;;  %v1830_v38 = vsel %vm1061_vm3, %v1713_v20, 0.0  ;;  %v3815_v27 = vpop.f32.mrb[57].mxu0  ;;  %v3821_v28 = vpop.f32.mrb[57].mxu1 }
 0x1a6   : > { %v1829_v39 = vadd.f32 %v1828_v37, %v1827_v34  ;;  %v1673_v40 = vpop.f32.mrb[58].mxu0  ;;  %v1716_v41 = vpop.f32.mrb[58].mxu1 }
 0x1a7   : > { %v3816_v42 = vpop.f32.mrb[59].mxu0  ;;  %v3822_v45 = vpop.f32.mrb[59].mxu1 }
 0x1a8   : > { %v1831_v59 = vadd.f32 %v1830_v38, %v1829_v39 }
 0x1ac   : > { %v1756_v46 = vpop.f32.mrb[60].mxu0  ;;  %v1799_v60 = vpop.f32.mrb[60].mxu1 }
 0x1ad   : > { %v1832_v47 = vsel %vm1061_vm3, %v1756_v46, 0.0  ;;  %v1834_v48 = vsel %vm1061_vm3, %v1799_v60, 0.0  ;;  %v3827_v49 = vpop.f32.mrb[61].mxu0  ;;  %v3833_v50 = vpop.f32.mrb[61].mxu1 }
 0x1ae   : > { %v1833_v0 = vadd.f32 %v1832_v47, %v1831_v59  ;;  %v1759_v53 = vpop.f32.mrb[62].mxu0  ;;  %v1802_v54 = vpop.f32.mrb[62].mxu1 }
 0x1af   : > { %v3828_v55 = vpop.f32.mrb[63].mxu0  ;;  %v3834_v56 = vpop.f32.mrb[63].mxu1 }
 0x1b0   : > { %v1835_v35 = vadd.f32 %v1834_v48, %v1833_v0 }
 0x1b2   : > { %v1836_v36 = vadd.f32 %v4903_v26, %v1835_v35 }
 0x1b4   : > { %3473 = vst [vmem:[%s4906_s9 + $0x4] sm:$0xf] %v1836_v36  ;;  %v1892_v57 = vpop.f32.mrb[64].mxu0  ;;  %v1935_v58 = vpop.f32.mrb[64].mxu1 }
 0x1b5   : > { %v2543_v61 = vsel %vm1061_vm3, %v1892_v57, 0.0  ;;  %v2544_v62 = vsel %vm1061_vm3, %v1935_v58, 0.0  ;;  %v3839_v63 = vpop.f32.mrb[65].mxu0  ;;  %v3845_v1 = vpop.f32.mrb[65].mxu1 }
 0x1b6   : > { %v2545_v2 = vadd.f32 %v2544_v62, %v2543_v61  ;;  %v1895_v3 = vpop.f32.mrb[66].mxu0  ;;  %v1938_v6 = vpop.f32.mrb[66].mxu1 }
 0x1b7   : > { %v3840_v7 = vpop.f32.mrb[67].mxu0  ;;  %v3846_v8 = vpop.f32.mrb[67].mxu1 }
 0x1bc   : > { %v1978_v9 = vpop.f32.mrb[68].mxu0  ;;  %v2021_v10 = vpop.f32.mrb[68].mxu1 }
 0x1bd   : > { %v2546_v13 = vsel %vm1061_vm3, %v1978_v9, 0.0  ;;  %v2548_v43 = vsel %vm1061_vm3, %v2021_v10, 0.0  ;;  %v3851_v44 = vpop.f32.mrb[69].mxu0  ;;  %v3857_v14 = vpop.f32.mrb[69].mxu1 }
 0x1be   : > { %v2547_v15 = vadd.f32 %v2546_v13, %v2545_v2  ;;  %v1981_v16 = vpop.f32.mrb[70].mxu0  ;;  %v2024_v17 = vpop.f32.mrb[70].mxu1 }
 0x1bf   : > { %v3852_v18 = vpop.f32.mrb[71].mxu0  ;;  %v3858_v21 = vpop.f32.mrb[71].mxu1 }
 0x1c0   : > { %v2549_v22 = vadd.f32 %v2548_v43, %v2547_v15 }
 0x1c4   : > { %v2064_v23 = vpop.f32.mrb[72].mxu0  ;;  %v2107_v24 = vpop.f32.mrb[72].mxu1 }
 0x1c5   : > { %v2550_v25 = vsel %vm1061_vm3, %v2064_v23, 0.0  ;;  %v2552_v29 = vsel %vm1061_vm3, %v2107_v24, 0.0  ;;  %v3863_v30 = vpop.f32.mrb[73].mxu0  ;;  %v3869_v4 = vpop.f32.mrb[73].mxu1 }
 0x1c6   : > { %v2551_v51 = vadd.f32 %v2550_v25, %v2549_v22  ;;  %v2067_v52 = vpop.f32.mrb[74].mxu0  ;;  %v2110_v5 = vpop.f32.mrb[74].mxu1 }
 0x1c7   : > { %v3864_v31 = vpop.f32.mrb[75].mxu0  ;;  %v3870_v32 = vpop.f32.mrb[75].mxu1 }
 0x1c8   : > { %v2553_v11 = vadd.f32 %v2552_v29, %v2551_v51 }
 0x1cc   : > { %v2150_v12 = vpop.f32.mrb[76].mxu0  ;;  %v2193_v33 = vpop.f32.mrb[76].mxu1 }
 0x1cd   : > { %v2554_v34 = vsel %vm1061_vm3, %v2150_v12, 0.0  ;;  %v2556_v19 = vsel %vm1061_vm3, %v2193_v33, 0.0  ;;  %v3875_v20 = vpop.f32.mrb[77].mxu0  ;;  %v3881_v37 = vpop.f32.mrb[77].mxu1 }
 0x1ce   : > { %v2555_v38 = vadd.f32 %v2554_v34, %v2553_v11  ;;  %v2153_v27 = vpop.f32.mrb[78].mxu0  ;;  %v2196_v28 = vpop.f32.mrb[78].mxu1 }
 0x1cf   : > { %v3876_v39 = vpop.f32.mrb[79].mxu0  ;;  %v3882_v40 = vpop.f32.mrb[79].mxu1 }
 0x1d0   : > { %v2557_v41 = vadd.f32 %v2556_v19, %v2555_v38 }
 0x1d4   : > { %v2236_v42 = vpop.f32.mrb[80].mxu0  ;;  %v2279_v45 = vpop.f32.mrb[80].mxu1 }
 0x1d5   : > { %v2558_v59 = vsel %vm1061_vm3, %v2236_v42, 0.0  ;;  %v2560_v46 = vsel %vm1061_vm3, %v2279_v45, 0.0  ;;  %v3887_v60 = vpop.f32.mrb[81].mxu0  ;;  %v3893_v47 = vpop.f32.mrb[81].mxu1 }
 0x1d6   : > { %v2559_v48 = vadd.f32 %v2558_v59, %v2557_v41  ;;  %v2239_v49 = vpop.f32.mrb[82].mxu0  ;;  %v2282_v50 = vpop.f32.mrb[82].mxu1 }
 0x1d7   : > { %v3888_v0 = vpop.f32.mrb[83].mxu0  ;;  %v3894_v53 = vpop.f32.mrb[83].mxu1 }
 0x1d8   : > { %v2561_v54 = vadd.f32 %v2560_v46, %v2559_v48 }
 0x1dc   : > { %v2322_v55 = vpop.f32.mrb[84].mxu0  ;;  %v2365_v56 = vpop.f32.mrb[84].mxu1 }
 0x1dd   : > { %v2562_v35 = vsel %vm1061_vm3, %v2322_v55, 0.0  ;;  %v2564_v36 = vsel %vm1061_vm3, %v2365_v56, 0.0  ;;  %v3899_v57 = vpop.f32.mrb[85].mxu0  ;;  %v3905_v58 = vpop.f32.mrb[85].mxu1 }
 0x1de   : > { %v2563_v61 = vadd.f32 %v2562_v35, %v2561_v54  ;;  %v2325_v62 = vpop.f32.mrb[86].mxu0  ;;  %v2368_v63 = vpop.f32.mrb[86].mxu1 }
 0x1df   : > { %v3900_v1 = vpop.f32.mrb[87].mxu0  ;;  %v3906_v2 = vpop.f32.mrb[87].mxu1 }
 0x1e0   : > { %v2565_v3 = vadd.f32 %v2564_v36, %v2563_v61 }
 0x1e4   : > { %v2408_v6 = vpop.f32.mrb[88].mxu0  ;;  %v2451_v7 = vpop.f32.mrb[88].mxu1 }
 0x1e5   : > { %v2566_v8 = vsel %vm1061_vm3, %v2408_v6, 0.0  ;;  %v2568_v9 = vsel %vm1061_vm3, %v2451_v7, 0.0  ;;  %v3911_v10 = vpop.f32.mrb[89].mxu0  ;;  %v3917_v13 = vpop.f32.mrb[89].mxu1 }
 0x1e6   : > { %v2567_v43 = vadd.f32 %v2566_v8, %v2565_v3  ;;  %v2411_v44 = vpop.f32.mrb[90].mxu0  ;;  %v2454_v14 = vpop.f32.mrb[90].mxu1 }
 0x1e7   : > { %v3912_v15 = vpop.f32.mrb[91].mxu0  ;;  %v3918_v16 = vpop.f32.mrb[91].mxu1 }
 0x1e8   : > { %v2569_v17 = vadd.f32 %v2568_v9, %v2567_v43 }
 0x1ec   : > { %v2494_v18 = vpop.f32.mrb[92].mxu0  ;;  %v2537_v21 = vpop.f32.mrb[92].mxu1 }
 0x1ed   : > { %v2570_v22 = vsel %vm1061_vm3, %v2494_v18, 0.0  ;;  %v2572_v23 = vsel %vm1061_vm3, %v2537_v21, 0.0  ;;  %v3923_v24 = vpop.f32.mrb[93].mxu0  ;;  %v3929_v25 = vpop.f32.mrb[93].mxu1 }
 0x1ee   : > { %v2571_v29 = vadd.f32 %v2570_v22, %v2569_v17  ;;  %v2497_v30 = vpop.f32.mrb[94].mxu0  ;;  %v2540_v4 = vpop.f32.mrb[94].mxu1 }
 0x1ef   : > { %v3924_v51 = vpop.f32.mrb[95].mxu0  ;;  %v3930_v52 = vpop.f32.mrb[95].mxu1 }
 0x1f0   : > { %v2573_v5 = vadd.f32 %v2572_v23, %v2571_v29 }
 0x1f2   : > { %v2574_v31 = vadd.f32 %v4903_v26, %v2573_v5 }
 0x1f4   : > { %3490 = vst [vmem:[%s4906_s9 + $0x8] sm:$0xf] %v2574_v31  ;;  %v2630_v32 = vpop.f32.mrb[96].mxu0  ;;  %v2673_v11 = vpop.f32.mrb[96].mxu1 }
 0x1f5   : > { %v3281_v12 = vsel %vm1061_vm3, %v2630_v32, 0.0  ;;  %v3282_v33 = vsel %vm1061_vm3, %v2673_v11, 0.0  ;;  %v3935_v34 = vpop.f32.mrb[97].mxu0  ;;  %v3941_v19 = vpop.f32.mrb[97].mxu1 }
 0x1f6   : > { %v3283_v20 = vadd.f32 %v3282_v33, %v3281_v12  ;;  %v2633_v37 = vpop.f32.mrb[98].mxu0  ;;  %v2676_v38 = vpop.f32.mrb[98].mxu1 }
 0x1f7   : > { %v3936_v27 = vpop.f32.mrb[99].mxu0  ;;  %v3942_v28 = vpop.f32.mrb[99].mxu1 }
 0x1fc   : > { %v2716_v39 = vpop.f32.mrb[100].mxu0  ;;  %v2759_v40 = vpop.f32.mrb[100].mxu1 }
 0x1fd   : > { %v3284_v41 = vsel %vm1061_vm3, %v2716_v39, 0.0  ;;  %v3286_v42 = vsel %vm1061_vm3, %v2759_v40, 0.0  ;;  %v3947_v45 = vpop.f32.mrb[101].mxu0  ;;  %v3953_v59 = vpop.f32.mrb[101].mxu1 }
 0x1fe   : > { %v3285_v46 = vadd.f32 %v3284_v41, %v3283_v20  ;;  %v2719_v60 = vpop.f32.mrb[102].mxu0  ;;  %v2762_v47 = vpop.f32.mrb[102].mxu1 }
 0x1ff   : > { %v3948_v48 = vpop.f32.mrb[103].mxu0  ;;  %v3954_v49 = vpop.f32.mrb[103].mxu1 }
 0x200   : > { %v3287_v50 = vadd.f32 %v3286_v42, %v3285_v46 }
 0x204   : > { %v2802_v0 = vpop.f32.mrb[104].mxu0  ;;  %v2845_v53 = vpop.f32.mrb[104].mxu1 }
 0x205   : > { %v3288_v54 = vsel %vm1061_vm3, %v2802_v0, 0.0  ;;  %v3290_v55 = vsel %vm1061_vm3, %v2845_v53, 0.0  ;;  %v3959_v56 = vpop.f32.mrb[105].mxu0  ;;  %v3965_v35 = vpop.f32.mrb[105].mxu1 }
 0x206   : > { %v3289_v36 = vadd.f32 %v3288_v54, %v3287_v50  ;;  %v2805_v57 = vpop.f32.mrb[106].mxu0  ;;  %v2848_v58 = vpop.f32.mrb[106].mxu1 }
 0x207   : > { %v3960_v61 = vpop.f32.mrb[107].mxu0  ;;  %v3966_v62 = vpop.f32.mrb[107].mxu1 }
 0x208   : > { %v3291_v63 = vadd.f32 %v3290_v55, %v3289_v36 }
 0x20c   : > { %v2888_v1 = vpop.f32.mrb[108].mxu0  ;;  %v2931_v2 = vpop.f32.mrb[108].mxu1 }
 0x20d   : > { %v3292_v3 = vsel %vm1061_vm3, %v2888_v1, 0.0  ;;  %v3294_v6 = vsel %vm1061_vm3, %v2931_v2, 0.0  ;;  %v3971_v7 = vpop.f32.mrb[109].mxu0  ;;  %v3977_v8 = vpop.f32.mrb[109].mxu1 }
 0x20e   : > { %v3293_v9 = vadd.f32 %v3292_v3, %v3291_v63  ;;  %v2891_v10 = vpop.f32.mrb[110].mxu0  ;;  %v2934_v13 = vpop.f32.mrb[110].mxu1 }
 0x20f   : > { %v3972_v43 = vpop.f32.mrb[111].mxu0  ;;  %v3978_v44 = vpop.f32.mrb[111].mxu1 }
 0x210   : > { %v3295_v14 = vadd.f32 %v3294_v6, %v3293_v9 }
 0x214   : > { %v2974_v15 = vpop.f32.mrb[112].mxu0  ;;  %v3017_v16 = vpop.f32.mrb[112].mxu1 }
 0x215   : > { %v3296_v17 = vsel %vm1061_vm3, %v2974_v15, 0.0  ;;  %v3298_v18 = vsel %vm1061_vm3, %v3017_v16, 0.0  ;;  %v3983_v21 = vpop.f32.mrb[113].mxu0  ;;  %v3989_v22 = vpop.f32.mrb[113].mxu1 }
 0x216   : > { %v3297_v23 = vadd.f32 %v3296_v17, %v3295_v14  ;;  %v2977_v24 = vpop.f32.mrb[114].mxu0  ;;  %v3020_v25 = vpop.f32.mrb[114].mxu1 }
 0x217   : > { %v3984_v29 = vpop.f32.mrb[115].mxu0  ;;  %v3990_v30 = vpop.f32.mrb[115].mxu1 }
 0x218   : > { %v3299_v4 = vadd.f32 %v3298_v18, %v3297_v23 }
 0x21c   : > { %v3060_v51 = vpop.f32.mrb[116].mxu0  ;;  %v3103_v52 = vpop.f32.mrb[116].mxu1 }
 0x21d   : > { %v3300_v5 = vsel %vm1061_vm3, %v3060_v51, 0.0  ;;  %v3302_v31 = vsel %vm1061_vm3, %v3103_v52, 0.0  ;;  %v3995_v32 = vpop.f32.mrb[117].mxu0  ;;  %v4001_v11 = vpop.f32.mrb[117].mxu1 }
 0x21e   : > { %v3301_v12 = vadd.f32 %v3300_v5, %v3299_v4  ;;  %v3063_v33 = vpop.f32.mrb[118].mxu0  ;;  %v3106_v34 = vpop.f32.mrb[118].mxu1 }
 0x21f   : > { %v3996_v19 = vpop.f32.mrb[119].mxu0  ;;  %v4002_v20 = vpop.f32.mrb[119].mxu1 }
 0x220   : > { %v3303_v37 = vadd.f32 %v3302_v31, %v3301_v12 }
 0x224   : > { %v3146_v38 = vpop.f32.mrb[120].mxu0  ;;  %v3189_v27 = vpop.f32.mrb[120].mxu1 }
 0x225   : > { %v3304_v28 = vsel %vm1061_vm3, %v3146_v38, 0.0  ;;  %v3306_v39 = vsel %vm1061_vm3, %v3189_v27, 0.0  ;;  %v4007_v40 = vpop.f32.mrb[121].mxu0  ;;  %v4013_v41 = vpop.f32.mrb[121].mxu1 }
 0x226   : > { %v3305_v42 = vadd.f32 %v3304_v28, %v3303_v37  ;;  %v3149_v45 = vpop.f32.mrb[122].mxu0  ;;  %v3192_v59 = vpop.f32.mrb[122].mxu1 }
 0x227   : > { %v4008_v46 = vpop.f32.mrb[123].mxu0  ;;  %v4014_v60 = vpop.f32.mrb[123].mxu1 }
 0x228   : > { %v3307_v47 = vadd.f32 %v3306_v39, %v3305_v42 }
 0x22c   : > { %v3232_v48 = vpop.f32.mrb[124].mxu0  ;;  %v3275_v49 = vpop.f32.mrb[124].mxu1 }
 0x22d   : > { %v3308_v50 = vsel %vm1061_vm3, %v3232_v48, 0.0  ;;  %v3310_v0 = vsel %vm1061_vm3, %v3275_v49, 0.0  ;;  %v4019_v53 = vpop.f32.mrb[125].mxu0  ;;  %v4025_v54 = vpop.f32.mrb[125].mxu1 }
 0x22e   : > { %v3309_v55 = vadd.f32 %v3308_v50, %v3307_v47  ;;  %v3235_v56 = vpop.f32.mrb[126].mxu0  ;;  %v3278_v35 = vpop.f32.mrb[126].mxu1 }
 0x22f   : > { %v4020_v36 = vpop.f32.mrb[127].mxu0  ;;  %v4026_v57 = vpop.f32.mrb[127].mxu1 }
 0x230   : > { %v3311_v58 = vadd.f32 %v3310_v0, %v3309_v55 }
 0x232   : > { %v3312_v61 = vadd.f32 %v4903_v26, %v3311_v58 }
 0x234   : > { %3507 = vst [vmem:[%s4906_s9 + $0xc] sm:$0xf] %v3312_v61 }
 0x235   : > { %4179 = shalt.err (!%p4176_p5)
}
 0x236   : > { %s4180_s29 = scalar_lea.hbm %s4968_s7, 256  ;;  %s4184_s20 = scalar_lea.hbm %s5022_s3, 512 }
 0x237   : > { %p4181_p9 = scmp.ne.s32.totalorder %s4968_s7, %s4180_s29  ;;  %p4185_p3 = scmp.lt.u32.totalorder %s4968_s7, %s5022_s3 }
 0x238   : > { %p4186_p7 = scmp.lt.u32.totalorder %s4184_s20, %s4180_s29  ;;  %p4188_p4 = scmp.lt.u32.totalorder %s4180_s29, %s4968_s7 }
 0x239   : > { %p4182_p1 = pnand %p4181_p9, %p4381_p10 }
 0x23a   : > { %p4187_p13 = por %p4186_p7, %p4185_p3 }
 0x23b   : > { %p4183_p2 = pneg %p4182_p1 }
 0x23c   : > { %p4189_p6 = por %p4188_p4, %p4187_p13 }
 0x23e   : > { %p4190_p8 = pnand %p4189_p6, %p4183_p2 }
 0x240   : > { %4193 = shalt.err (!%p4190_p8)
}
 0x241   : > { %s4263_s9 = smov 64   ;;  %s4264_s11 = smov 4  }
 0x242   : > { %4033 = dma.vmem_to_hbm [thread:$0]  (%p4381_p10), %s4963_s10, 256, %s4968_s7, %s3316_s8, %s4263_s9, %s4263_s9, %s4264_s11  }
 0x243 PF: > { %s3346_s18 = sand.u32 1, %s4232_s12   ;;  %p5040_p12 = scmp.ne.s32.totalorder %s5030_s23, 0 }
 0x244   : > { %p5041_p11 = scmp.ge.s32.totalorder %s4252_s17, 2  ;;  %s3347_s26 = scalar_lea.sflag [#allocation4], %s3346_s18 }
 0x246   : > { %p4044_p0 = pnand %p5041_p11, %p5040_p12 }
 0x248   : > { %4227 = dma.done.wait (!%p4044_p0), %s3347_s26, 256  }
 0x249   : > { %4229 = vsyncadd (!%p4044_p0), %s3347_s26, 4294967040  ;;  %s20_s17 = sadd.s32 1, %s4252_s17   ;;  %s5042_s12 = smov %s4236_s13 }
 0x24a   : > { %p17_p5 = scmp.ge.s32.totalorder %s20_s17, 4   ;;  %s5043_s13 = smov %s4240_s14 }
 0x24b   : > { %s5044_s14 = smov %s4390_s5  ;;  %s5045_s15 = smov %s4248_s16 }
 0x24c   : > { %s5046_s16 = smov %s5048_s28  ;;  %19 = sbr.rel (!%p17_p5) target bundleno = 7 (0x7), region = 84 }
 0x253   :  { %3352 = vsyncpa [#allocation3], 1 }
 0x254   :  { %3354 = vsyncpa [#allocation3 + $0x1], 1 }
 0x255   :  { %3355 = vsyncpa [#allocation6], 1 }
 0x256   :  { %3356 = vsyncpa [#allocation4], 1 }
 0x257   :  { %3358 = vsyncpa [#allocation4 + $0x1], 1 }

</bundles_post_ra>
